<compile_context>
chip_gen: v7x
topology: tpu7x:2x2x1
jax: 0.10.0
libtpu: 0.0.40
codegen_flags: <defaults>
</compile_context>

<pallas_src>
import functools

import jax
import jax.numpy as jnp
import numpy as np
from jax.experimental import pallas as pl
from jax.experimental.pallas import tpu as pltpu


def _round_up(a, b):
    return -(-a // b) * b


def _downsamp_kernel(xp_ref, w_ref, y_ref, xcol_ref, *, taps, sps, Kp, C, Ltile):
    """One (batch, time-tile) grid step.

    xp_ref   : (1, 1, 2*sps*C, Lslab)  polyphase input slab; rows ordered (part, r, ci)
               with part 0=real / 1=imag, r = polyphase branch, ci = input channel.
    w_ref    : (8, K)   block-complex weight, K = 2*taps*C, cols ordered (part, k, ci);
               rows [0:Cout] -> real out, [Cout:2*Cout] -> imag out, rest zero padding.
    y_ref    : (1, 8, Ltile)   merged real/imag output tile (lane-dense: Ltile % 128 == 0).
    xcol_ref : (K, Ltile)      VMEM scratch -- tile-local im2col slab.
    """
    # Build the im2col slab: row (part, k=q*sps+r, ci) <- x_part[ci, (t + q)*sps + r].
    # Each row group is a contiguous lane window of the polyphase input (cheap copy);
    # no accumulator is carried, so the static unroll keeps live vreg count tiny.
    for part in range(2):
        for r in range(sps):
            src = (part * sps + r) * C
            for q in range(Kp):
                k = q * sps + r
                if k >= taps:
                    continue
                dst = part * taps * C + k * C
                xcol_ref[pl.ds(dst, C), :] = xp_ref[0, 0, pl.ds(src, C), pl.ds(q, Ltile)]
    # The whole complex strided conv for this tile = one MXU matmul (K = 2*taps*C).
    y_ref[0] = jnp.dot(w_ref[...], xcol_ref[...], preferred_element_type=jnp.float32)


@functools.partial(jax.jit, static_argnames=("sps", "time_tile"))
def downsamp_forward(x, Wr, Wi, sps=2, time_tile=512):
    """x: (B, L, Nmodes) complex64 -> (B, Lout, Nmodes) complex64."""
    B, L, C = x.shape
    Cout, Cin, taps = Wr.shape
    assert Cin == C
    Lout = (L - taps) // sps + 1
    assert Lout > 0
    Kp = -(-taps // sps)                 # taps per polyphase branch (ceil)
    K = 2 * taps * Cin                   # contraction length of the block-complex matmul
    Mrows = _round_up(2 * Cout, 8)       # pad output rows to full sublanes

    # Lane-dense time tile (multiple of 128); shrink for short signals.
    Ltile = min(_round_up(time_tile, 128), _round_up(Lout, 128))
    nT = -(-Lout // Ltile)
    Lout_pad = nT * Ltile
    Lslab = Ltile + Kp - 1               # per-tile input window incl. conv halo
    Lp_total = Lout_pad + Kp - 1
    L_need = sps * Lp_total

    # ---- wrapper glue (kept to ~2 passes over the input) ----
    # complex -> merged real/imag; pad/crop time; single reshape+transpose into
    # polyphase NCL layout (B, 2*sps*C, Lp_total), row index = part*sps*C + r*C + ci.
    xf = jnp.stack([jnp.real(x), jnp.imag(x)], axis=1).astype(jnp.float32)   # (B,2,L,C)
    if L_need >= L:
        xf = jnp.pad(xf, ((0, 0), (0, 0), (0, L_need - L), (0, 0)))
    else:
        xf = xf[:, :, :L_need, :]        # dropped tail never reaches a valid output
    xp = xf.reshape(B, 2, Lp_total, sps, C)
    xp = jnp.transpose(xp, (0, 1, 3, 4, 2)).reshape(B, 2 * sps * C, Lp_total)
    # Per-tile slabs with halo so grid blocks never overlap (~3% duplication).
    idx = jnp.arange(nT)[:, None] * Ltile + jnp.arange(Lslab)[None, :]       # (nT, Lslab)
    xp_t = jnp.transpose(xp[:, :, idx], (0, 2, 1, 3))                        # (B,nT,2spsC,Lslab)

    # Block-complex weight (Mrows, K); columns ordered (part, k, ci) to match the slab.
    Wr_kc = jnp.transpose(Wr, (0, 2, 1)).reshape(Cout, taps * Cin).astype(jnp.float32)
    Wi_kc = jnp.transpose(Wi, (0, 2, 1)).reshape(Cout, taps * Cin).astype(jnp.float32)
    M = jnp.concatenate(
        [jnp.concatenate([Wr_kc, -Wi_kc], axis=1),
         jnp.concatenate([Wi_kc, Wr_kc], axis=1)], axis=0)                   # (2*Cout, K)
    M = jnp.pad(M, ((0, Mrows - 2 * Cout), (0, 0)))

    kernel = functools.partial(_downsamp_kernel, taps=taps, sps=sps, Kp=Kp,
                               C=C, Ltile=Ltile)

    out = pl.pallas_call(
        kernel,
        out_shape=jax.ShapeDtypeStruct((B, Mrows, Lout_pad), jnp.float32),
        grid_spec=pltpu.PrefetchScalarGridSpec(
            num_scalar_prefetch=0,
            grid=(B, nT),
            in_specs=[
                pl.BlockSpec((1, 1, 2 * sps * C, Lslab), lambda b, t: (b, t, 0, 0)),
                pl.BlockSpec((Mrows, K), lambda b, t: (0, 0)),
            ],
            out_specs=pl.BlockSpec((1, Mrows, Ltile), lambda b, t: (b, 0, t)),
            scratch_shapes=[pltpu.VMEM((K, Ltile), jnp.float32)],
        ),
        compiler_params=pltpu.CompilerParams(
            dimension_semantics=("parallel", "parallel")),
    )(xp_t, M)

    y = (out[:, :Cout, :Lout] + 1j * out[:, Cout:2 * Cout, :Lout]).astype(jnp.complex64)
    return jnp.transpose(y, (0, 2, 1))                                       # (B, Lout, Nmodes)


def reference_forward(x, Wr, Wi, sps=2):
    """Pure-JAX reference mirroring the PyTorch module forward."""
    xr = jnp.transpose(jnp.real(x), (0, 2, 1)).astype(jnp.float32)
    xi = jnp.transpose(jnp.imag(x), (0, 2, 1)).astype(jnp.float32)
    dn = ('NCH', 'OIH', 'NCH')
    conv = lambda a, w: jax.lax.conv_general_dilated(
        a, w, window_strides=(sps,), padding='VALID', dimension_numbers=dn)
    yr = conv(xr, Wr) - conv(xi, Wi)
    yi = conv(xr, Wi) + conv(xi, Wr)
    y = (yr + 1j * yi).astype(jnp.complex64)
    return jnp.transpose(y, (0, 2, 1))


if __name__ == "__main__":
    taps, sps, Nmodes = 32, 2, 2

    key = jax.random.PRNGKey(0)
    k1, k2, k3, k4 = jax.random.split(key, 4)
    # ComplexConv1d(Nmodes, Nmodes, taps, bias=False): real & imag weights of shape
    # (Nmodes, Nmodes, taps). The module default init='zeros' would give an all-zero
    # output, so use deterministic random weights to make the check meaningful.
    Wr = 0.1 * jax.random.normal(k3, (Nmodes, Nmodes, taps), jnp.float32)
    Wi = 0.1 * jax.random.normal(k4, (Nmodes, Nmodes, taps), jnp.float32)

    # (B=2, L=96): single time tile.  (B=2, L=1184): exercises the multi-tile/halo path.
    for (B, L) in [(2, 96), (2, 1184)]:
        kx = jax.random.fold_in(k1, L)
        ky = jax.random.fold_in(k2, L)
        x = (jax.random.normal(kx, (B, L, Nmodes), jnp.float32)
             + 1j * jax.random.normal(ky, (B, L, Nmodes), jnp.float32)).astype(jnp.complex64)

        y = jax.block_until_ready(downsamp_forward(x, Wr, Wi, sps=sps))
        y_ref = reference_forward(x, Wr, Wi, sps=sps)
        # Tolerance sized for possible reduced-precision MXU f32 passes; typical
        # observed error of the f32 path is ~1e-6.
        np.testing.assert_allclose(np.asarray(y), np.asarray(y_ref), rtol=2e-2, atol=2e-2)

    print("KERNEL_OK")
</pallas_src>

<mosaic_0001>
module attributes {stable_mosaic.version = 11 : i64} {
  func.func @_downsamp_kernel(%arg0: i32, %arg1: i32, %arg2: memref<1x1x8x143xf32, #tpu.memory_space<vmem>>, %arg3: memref<8x128xf32, #tpu.memory_space<vmem>>, %arg4: memref<1x8x128xf32, #tpu.memory_space<vmem>>, %arg5: memref<128x128xf32, #tpu.memory_space<vmem>>) attributes {dimension_semantics = [#tpu.dimension_semantics<parallel>, #tpu.dimension_semantics<parallel>], iteration_bounds = array<i64: 2, 1>, scalar_prefetch = 0 : i64, scratch_operands = 1 : i64, tpu.core_type = #tpu.core_type<tc>, window_params = [{transform_indices = @transform_0, window_bounds = array<i64: 1, 1, 8, 143>}, {pipeline_mode = #tpu.pipeline_mode<synchronous>, transform_indices = @transform_1, window_bounds = array<i64: 8, 128>}, {transform_indices = @transform_2, window_bounds = array<i64: 1, 8, 128>}]} {
    %c0 = arith.constant 0 : index
    %c0_0 = arith.constant 0 : index
    %c0_1 = arith.constant 0 : index
    %c0_2 = arith.constant 0 : index
    %0 = vector.load %arg2[%c0, %c0_0, %c0_1, %c0_2] : memref<1x1x8x143xf32, #tpu.memory_space<vmem>>, vector<1x1x2x128xf32>
    %1 = vector.shape_cast %0 : vector<1x1x2x128xf32> to vector<2x128xf32>
    %c0_3 = arith.constant 0 : index
    %c0_4 = arith.constant 0 : index
    %2 = vector.load %arg5[%c0_3, %c0_4] : memref<128x128xf32, #tpu.memory_space<vmem>>, vector<2x128xf32>
    tpu.vector_store %arg5[%c0_3, %c0_4], %1 {strides = array<i32>} : memref<128x128xf32, #tpu.memory_space<vmem>>, vector<2x128xf32>,
    %c0_5 = arith.constant 0 : index
    %c0_6 = arith.constant 0 : index
    %c0_7 = arith.constant 0 : index
    %c1 = arith.constant 1 : index
    %3 = vector.load %arg2[%c0_5, %c0_6, %c0_7, %c1] : memref<1x1x8x143xf32, #tpu.memory_space<vmem>>, vector<1x1x2x128xf32>
    %4 = vector.shape_cast %3 : vector<1x1x2x128xf32> to vector<2x128xf32>
    %c4 = arith.constant 4 : index
    %c0_8 = arith.constant 0 : index
    %5 = vector.load %arg5[%c4, %c0_8] : memref<128x128xf32, #tpu.memory_space<vmem>>, vector<2x128xf32>
    tpu.vector_store %arg5[%c4, %c0_8], %4 {strides = array<i32>} : memref<128x128xf32, #tpu.memory_space<vmem>>, vector<2x128xf32>,
    %c0_9 = arith.constant 0 : index
    %c0_10 = arith.constant 0 : index
    %c0_11 = arith.constant 0 : index
    %c2 = arith.constant 2 : index
    %6 = vector.load %arg2[%c0_9, %c0_10, %c0_11, %c2] : memref<1x1x8x143xf32, #tpu.memory_space<vmem>>, vector<1x1x2x128xf32>
    %7 = vector.shape_cast %6 : vector<1x1x2x128xf32> to vector<2x128xf32>
    %c8 = arith.constant 8 : index
    %c0_12 = arith.constant 0 : index
    %8 = vector.load %arg5[%c8, %c0_12] : memref<128x128xf32, #tpu.memory_space<vmem>>, vector<2x128xf32>
    tpu.vector_store %arg5[%c8, %c0_12], %7 {strides = array<i32>} : memref<128x128xf32, #tpu.memory_space<vmem>>, vector<2x128xf32>,
    %c0_13 = arith.constant 0 : index
    %c0_14 = arith.constant 0 : index
    %c0_15 = arith.constant 0 : index
    %c3 = arith.constant 3 : index
    %9 = vector.load %arg2[%c0_13, %c0_14, %c0_15, %c3] : memref<1x1x8x143xf32, #tpu.memory_space<vmem>>, vector<1x1x2x128xf32>
    %10 = vector.shape_cast %9 : vector<1x1x2x128xf32> to vector<2x128xf32>
    %c12 = arith.constant 12 : index
    %c0_16 = arith.constant 0 : index
    %11 = vector.load %arg5[%c12, %c0_16] : memref<128x128xf32, #tpu.memory_space<vmem>>, vector<2x128xf32>
    tpu.vector_store %arg5[%c12, %c0_16], %10 {strides = array<i32>} : memref<128x128xf32, #tpu.memory_space<vmem>>, vector<2x128xf32>,
    %c0_17 = arith.constant 0 : index
    %c0_18 = arith.constant 0 : index
    %c0_19 = arith.constant 0 : index
    %c4_20 = arith.constant 4 : index
    %12 = vector.load %arg2[%c0_17, %c0_18, %c0_19, %c4_20] : memref<1x1x8x143xf32, #tpu.memory_space<vmem>>, vector<1x1x2x128xf32>
    %13 = vector.shape_cast %12 : vector<1x1x2x128xf32> to vector<2x128xf32>
    %c16 = arith.constant 16 : index
    %c0_21 = arith.constant 0 : index
    %14 = vector.load %arg5[%c16, %c0_21] : memref<128x128xf32, #tpu.memory_space<vmem>>, vector<2x128xf32>
    tpu.vector_store %arg5[%c16, %c0_21], %13 {strides = array<i32>} : memref<128x128xf32, #tpu.memory_space<vmem>>, vector<2x128xf32>,
    %c0_22 = arith.constant 0 : index
    %c0_23 = arith.constant 0 : index
    %c0_24 = arith.constant 0 : index
    %c5 = arith.constant 5 : index
    %15 = vector.load %arg2[%c0_22, %c0_23, %c0_24, %c5] : memref<1x1x8x143xf32, #tpu.memory_space<vmem>>, vector<1x1x2x128xf32>
    %16 = vector.shape_cast %15 : vector<1x1x2x128xf32> to vector<2x128xf32>
    %c20 = arith.constant 20 : index
    %c0_25 = arith.constant 0 : index
    %17 = vector.load %arg5[%c20, %c0_25] : memref<128x128xf32, #tpu.memory_space<vmem>>, vector<2x128xf32>
    tpu.vector_store %arg5[%c20, %c0_25], %16 {strides = array<i32>} : memref<128x128xf32, #tpu.memory_space<vmem>>, vector<2x128xf32>,
    %c0_26 = arith.constant 0 : index
    %c0_27 = arith.constant 0 : index
    %c0_28 = arith.constant 0 : index
    %c6 = arith.constant 6 : index
    %18 = vector.load %arg2[%c0_26, %c0_27, %c0_28, %c6] : memref<1x1x8x143xf32, #tpu.memory_space<vmem>>, vector<1x1x2x128xf32>
    %19 = vector.shape_cast %18 : vector<1x1x2x128xf32> to vector<2x128xf32>
    %c24 = arith.constant 24 : index
    %c0_29 = arith.constant 0 : index
    %20 = vector.load %arg5[%c24, %c0_29] : memref<128x128xf32, #tpu.memory_space<vmem>>, vector<2x128xf32>
    tpu.vector_store %arg5[%c24, %c0_29], %19 {strides = array<i32>} : memref<128x128xf32, #tpu.memory_space<vmem>>, vector<2x128xf32>,
    %c0_30 = arith.constant 0 : index
    %c0_31 = arith.constant 0 : index
    %c0_32 = arith.constant 0 : index
    %c7 = arith.constant 7 : index
    %21 = vector.load %arg2[%c0_30, %c0_31, %c0_32, %c7] : memref<1x1x8x143xf32, #tpu.memory_space<vmem>>, vector<1x1x2x128xf32>
    %22 = vector.shape_cast %21 : vector<1x1x2x128xf32> to vector<2x128xf32>
    %c28 = arith.constant 28 : index
    %c0_33 = arith.constant 0 : index
    %23 = vector.load %arg5[%c28, %c0_33] : memref<128x128xf32, #tpu.memory_space<vmem>>, vector<2x128xf32>
    tpu.vector_store %arg5[%c28, %c0_33], %22 {strides = array<i32>} : memref<128x128xf32, #tpu.memory_space<vmem>>, vector<2x128xf32>,
    %c0_34 = arith.constant 0 : index
    %c0_35 = arith.constant 0 : index
    %c0_36 = arith.constant 0 : index
    %c8_37 = arith.constant 8 : index
    %24 = vector.load %arg2[%c0_34, %c0_35, %c0_36, %c8_37] : memref<1x1x8x143xf32, #tpu.memory_space<vmem>>, vector<1x1x2x128xf32>
    %25 = vector.shape_cast %24 : vector<1x1x2x128xf32> to vector<2x128xf32>
    %c32 = arith.constant 32 : index
    %c0_38 = arith.constant 0 : index
    %26 = vector.load %arg5[%c32, %c0_38] : memref<128x128xf32, #tpu.memory_space<vmem>>, vector<2x128xf32>
    tpu.vector_store %arg5[%c32, %c0_38], %25 {strides = array<i32>} : memref<128x128xf32, #tpu.memory_space<vmem>>, vector<2x128xf32>,
    %c0_39 = arith.constant 0 : index
    %c0_40 = arith.constant 0 : index
    %c0_41 = arith.constant 0 : index
    %c9 = arith.constant 9 : index
    %27 = vector.load %arg2[%c0_39, %c0_40, %c0_41, %c9] : memref<1x1x8x143xf32, #tpu.memory_space<vmem>>, vector<1x1x2x128xf32>
    %28 = vector.shape_cast %27 : vector<1x1x2x128xf32> to vector<2x128xf32>
    %c36 = arith.constant 36 : index
    %c0_42 = arith.constant 0 : index
    %29 = vector.load %arg5[%c36, %c0_42] : memref<128x128xf32, #tpu.memory_space<vmem>>, vector<2x128xf32>
    tpu.vector_store %arg5[%c36, %c0_42], %28 {strides = array<i32>} : memref<128x128xf32, #tpu.memory_space<vmem>>, vector<2x128xf32>,
    %c0_43 = arith.constant 0 : index
    %c0_44 = arith.constant 0 : index
    %c0_45 = arith.constant 0 : index
    %c10 = arith.constant 10 : index
    %30 = vector.load %arg2[%c0_43, %c0_44, %c0_45, %c10] : memref<1x1x8x143xf32, #tpu.memory_space<vmem>>, vector<1x1x2x128xf32>
    %31 = vector.shape_cast %30 : vector<1x1x2x128xf32> to vector<2x128xf32>
    %c40 = arith.constant 40 : index
    %c0_46 = arith.constant 0 : index
    %32 = vector.load %arg5[%c40, %c0_46] : memref<128x128xf32, #tpu.memory_space<vmem>>, vector<2x128xf32>
    tpu.vector_store %arg5[%c40, %c0_46], %31 {strides = array<i32>} : memref<128x128xf32, #tpu.memory_space<vmem>>, vector<2x128xf32>,
    %c0_47 = arith.constant 0 : index
    %c0_48 = arith.constant 0 : index
    %c0_49 = arith.constant 0 : index
    %c11 = arith.constant 11 : index
    %33 = vector.load %arg2[%c0_47, %c0_48, %c0_49, %c11] : memref<1x1x8x143xf32, #tpu.memory_space<vmem>>, vector<1x1x2x128xf32>
    %34 = vector.shape_cast %33 : vector<1x1x2x128xf32> to vector<2x128xf32>
    %c44 = arith.constant 44 : index
    %c0_50 = arith.constant 0 : index
    %35 = vector.load %arg5[%c44, %c0_50] : memref<128x128xf32, #tpu.memory_space<vmem>>, vector<2x128xf32>
    tpu.vector_store %arg5[%c44, %c0_50], %34 {strides = array<i32>} : memref<128x128xf32, #tpu.memory_space<vmem>>, vector<2x128xf32>,
    %c0_51 = arith.constant 0 : index
    %c0_52 = arith.constant 0 : index
    %c0_53 = arith.constant 0 : index
    %c12_54 = arith.constant 12 : index
    %36 = vector.load %arg2[%c0_51, %c0_52, %c0_53, %c12_54] : memref<1x1x8x143xf32, #tpu.memory_space<vmem>>, vector<1x1x2x128xf32>
    %37 = vector.shape_cast %36 : vector<1x1x2x128xf32> to vector<2x128xf32>
    %c48 = arith.constant 48 : index
    %c0_55 = arith.constant 0 : index
    %38 = vector.load %arg5[%c48, %c0_55] : memref<128x128xf32, #tpu.memory_space<vmem>>, vector<2x128xf32>
    tpu.vector_store %arg5[%c48, %c0_55], %37 {strides = array<i32>} : memref<128x128xf32, #tpu.memory_space<vmem>>, vector<2x128xf32>,
    %c0_56 = arith.constant 0 : index
    %c0_57 = arith.constant 0 : index
    %c0_58 = arith.constant 0 : index
    %c13 = arith.constant 13 : index
    %39 = vector.load %arg2[%c0_56, %c0_57, %c0_58, %c13] : memref<1x1x8x143xf32, #tpu.memory_space<vmem>>, vector<1x1x2x128xf32>
    %40 = vector.shape_cast %39 : vector<1x1x2x128xf32> to vector<2x128xf32>
    %c52 = arith.constant 52 : index
    %c0_59 = arith.constant 0 : index
    %41 = vector.load %arg5[%c52, %c0_59] : memref<128x128xf32, #tpu.memory_space<vmem>>, vector<2x128xf32>
    tpu.vector_store %arg5[%c52, %c0_59], %40 {strides = array<i32>} : memref<128x128xf32, #tpu.memory_space<vmem>>, vector<2x128xf32>,
    %c0_60 = arith.constant 0 : index
    %c0_61 = arith.constant 0 : index
    %c0_62 = arith.constant 0 : index
    %c14 = arith.constant 14 : index
    %42 = vector.load %arg2[%c0_60, %c0_61, %c0_62, %c14] : memref<1x1x8x143xf32, #tpu.memory_space<vmem>>, vector<1x1x2x128xf32>
    %43 = vector.shape_cast %42 : vector<1x1x2x128xf32> to vector<2x128xf32>
    %c56 = arith.constant 56 : index
    %c0_63 = arith.constant 0 : index
    %44 = vector.load %arg5[%c56, %c0_63] : memref<128x128xf32, #tpu.memory_space<vmem>>, vector<2x128xf32>
    tpu.vector_store %arg5[%c56, %c0_63], %43 {strides = array<i32>} : memref<128x128xf32, #tpu.memory_space<vmem>>, vector<2x128xf32>,
    %c0_64 = arith.constant 0 : index
    %c0_65 = arith.constant 0 : index
    %c0_66 = arith.constant 0 : index
    %c15 = arith.constant 15 : index
    %45 = vector.load %arg2[%c0_64, %c0_65, %c0_66, %c15] : memref<1x1x8x143xf32, #tpu.memory_space<vmem>>, vector<1x1x2x128xf32>
    %46 = vector.shape_cast %45 : vector<1x1x2x128xf32> to vector<2x128xf32>
    %c60 = arith.constant 60 : index
    %c0_67 = arith.constant 0 : index
    %47 = vector.load %arg5[%c60, %c0_67] : memref<128x128xf32, #tpu.memory_space<vmem>>, vector<2x128xf32>
    tpu.vector_store %arg5[%c60, %c0_67], %46 {strides = array<i32>} : memref<128x128xf32, #tpu.memory_space<vmem>>, vector<2x128xf32>,
    %c0_68 = arith.constant 0 : index
    %c0_69 = arith.constant 0 : index
    %c2_70 = arith.constant 2 : index
    %c0_71 = arith.constant 0 : index
    %48 = vector.load %arg2[%c0_68, %c0_69, %c2_70, %c0_71] : memref<1x1x8x143xf32, #tpu.memory_space<vmem>>, vector<1x1x2x128xf32>
    %49 = vector.shape_cast %48 : vector<1x1x2x128xf32> to vector<2x128xf32>
    %c2_72 = arith.constant 2 : index
    %c0_73 = arith.constant 0 : index
    %50 = vector.load %arg5[%c2_72, %c0_73] : memref<128x128xf32, #tpu.memory_space<vmem>>, vector<2x128xf32>
    tpu.vector_store %arg5[%c2_72, %c0_73], %49 {strides = array<i32>} : memref<128x128xf32, #tpu.memory_space<vmem>>, vector<2x128xf32>,
    %c0_74 = arith.constant 0 : index
    %c0_75 = arith.constant 0 : index
    %c2_76 = arith.constant 2 : index
    %c1_77 = arith.constant 1 : index
    %51 = vector.load %arg2[%c0_74, %c0_75, %c2_76, %c1_77] : memref<1x1x8x143xf32, #tpu.memory_space<vmem>>, vector<1x1x2x128xf32>
    %52 = vector.shape_cast %51 : vector<1x1x2x128xf32> to vector<2x128xf32>
    %c6_78 = arith.constant 6 : index
    %c0_79 = arith.constant 0 : index
    %53 = vector.load %arg5[%c6_78, %c0_79] : memref<128x128xf32, #tpu.memory_space<vmem>>, vector<2x128xf32>
    tpu.vector_store %arg5[%c6_78, %c0_79], %52 {strides = array<i32>} : memref<128x128xf32, #tpu.memory_space<vmem>>, vector<2x128xf32>,
    %c0_80 = arith.constant 0 : index
    %c0_81 = arith.constant 0 : index
    %c2_82 = arith.constant 2 : index
    %c2_83 = arith.constant 2 : index
    %54 = vector.load %arg2[%c0_80, %c0_81, %c2_82, %c2_83] : memref<1x1x8x143xf32, #tpu.memory_space<vmem>>, vector<1x1x2x128xf32>
    %55 = vector.shape_cast %54 : vector<1x1x2x128xf32> to vector<2x128xf32>
    %c10_84 = arith.constant 10 : index
    %c0_85 = arith.constant 0 : index
    %56 = vector.load %arg5[%c10_84, %c0_85] : memref<128x128xf32, #tpu.memory_space<vmem>>, vector<2x128xf32>
    tpu.vector_store %arg5[%c10_84, %c0_85], %55 {strides = array<i32>} : memref<128x128xf32, #tpu.memory_space<vmem>>, vector<2x128xf32>,
    %c0_86 = arith.constant 0 : index
    %c0_87 = arith.constant 0 : index
    %c2_88 = arith.constant 2 : index
    %c3_89 = arith.constant 3 : index
    %57 = vector.load %arg2[%c0_86, %c0_87, %c2_88, %c3_89] : memref<1x1x8x143xf32, #tpu.memory_space<vmem>>, vector<1x1x2x128xf32>
    %58 = vector.shape_cast %57 : vector<1x1x2x128xf32> to vector<2x128xf32>
    %c14_90 = arith.constant 14 : index
    %c0_91 = arith.constant 0 : index
    %59 = vector.load %arg5[%c14_90, %c0_91] : memref<128x128xf32, #tpu.memory_space<vmem>>, vector<2x128xf32>
    tpu.vector_store %arg5[%c14_90, %c0_91], %58 {strides = array<i32>} : memref<128x128xf32, #tpu.memory_space<vmem>>, vector<2x128xf32>,
    %c0_92 = arith.constant 0 : index
    %c0_93 = arith.constant 0 : index
    %c2_94 = arith.constant 2 : index
    %c4_95 = arith.constant 4 : index
    %60 = vector.load %arg2[%c0_92, %c0_93, %c2_94, %c4_95] : memref<1x1x8x143xf32, #tpu.memory_space<vmem>>, vector<1x1x2x128xf32>
    %61 = vector.shape_cast %60 : vector<1x1x2x128xf32> to vector<2x128xf32>
    %c18 = arith.constant 18 : index
    %c0_96 = arith.constant 0 : index
    %62 = vector.load %arg5[%c18, %c0_96] : memref<128x128xf32, #tpu.memory_space<vmem>>, vector<2x128xf32>
    tpu.vector_store %arg5[%c18, %c0_96], %61 {strides = array<i32>} : memref<128x128xf32, #tpu.memory_space<vmem>>, vector<2x128xf32>,
    %c0_97 = arith.constant 0 : index
    %c0_98 = arith.constant 0 : index
    %c2_99 = arith.constant 2 : index
    %c5_100 = arith.constant 5 : index
    %63 = vector.load %arg2[%c0_97, %c0_98, %c2_99, %c5_100] : memref<1x1x8x143xf32, #tpu.memory_space<vmem>>, vector<1x1x2x128xf32>
    %64 = vector.shape_cast %63 : vector<1x1x2x128xf32> to vector<2x128xf32>
    %c22 = arith.constant 22 : index
    %c0_101 = arith.constant 0 : index
    %65 = vector.load %arg5[%c22, %c0_101] : memref<128x128xf32, #tpu.memory_space<vmem>>, vector<2x128xf32>
    tpu.vector_store %arg5[%c22, %c0_101], %64 {strides = array<i32>} : memref<128x128xf32, #tpu.memory_space<vmem>>, vector<2x128xf32>,
    %c0_102 = arith.constant 0 : index
    %c0_103 = arith.constant 0 : index
    %c2_104 = arith.constant 2 : index
    %c6_105 = arith.constant 6 : index
    %66 = vector.load %arg2[%c0_102, %c0_103, %c2_104, %c6_105] : memref<1x1x8x143xf32, #tpu.memory_space<vmem>>, vector<1x1x2x128xf32>
    %67 = vector.shape_cast %66 : vector<1x1x2x128xf32> to vector<2x128xf32>
    %c26 = arith.constant 26 : index
    %c0_106 = arith.constant 0 : index
    %68 = vector.load %arg5[%c26, %c0_106] : memref<128x128xf32, #tpu.memory_space<vmem>>, vector<2x128xf32>
    tpu.vector_store %arg5[%c26, %c0_106], %67 {strides = array<i32>} : memref<128x128xf32, #tpu.memory_space<vmem>>, vector<2x128xf32>,
    %c0_107 = arith.constant 0 : index
    %c0_108 = arith.constant 0 : index
    %c2_109 = arith.constant 2 : index
    %c7_110 = arith.constant 7 : index
    %69 = vector.load %arg2[%c0_107, %c0_108, %c2_109, %c7_110] : memref<1x1x8x143xf32, #tpu.memory_space<vmem>>, vector<1x1x2x128xf32>
    %70 = vector.shape_cast %69 : vector<1x1x2x128xf32> to vector<2x128xf32>
    %c30 = arith.constant 30 : index
    %c0_111 = arith.constant 0 : index
    %71 = vector.load %arg5[%c30, %c0_111] : memref<128x128xf32, #tpu.memory_space<vmem>>, vector<2x128xf32>
    tpu.vector_store %arg5[%c30, %c0_111], %70 {strides = array<i32>} : memref<128x128xf32, #tpu.memory_space<vmem>>, vector<2x128xf32>,
    %c0_112 = arith.constant 0 : index
    %c0_113 = arith.constant 0 : index
    %c2_114 = arith.constant 2 : index
    %c8_115 = arith.constant 8 : index
    %72 = vector.load %arg2[%c0_112, %c0_113, %c2_114, %c8_115] : memref<1x1x8x143xf32, #tpu.memory_space<vmem>>, vector<1x1x2x128xf32>
    %73 = vector.shape_cast %72 : vector<1x1x2x128xf32> to vector<2x128xf32>
    %c34 = arith.constant 34 : index
    %c0_116 = arith.constant 0 : index
    %74 = vector.load %arg5[%c34, %c0_116] : memref<128x128xf32, #tpu.memory_space<vmem>>, vector<2x128xf32>
    tpu.vector_store %arg5[%c34, %c0_116], %73 {strides = array<i32>} : memref<128x128xf32, #tpu.memory_space<vmem>>, vector<2x128xf32>,
    %c0_117 = arith.constant 0 : index
    %c0_118 = arith.constant 0 : index
    %c2_119 = arith.constant 2 : index
    %c9_120 = arith.constant 9 : index
    %75 = vector.load %arg2[%c0_117, %c0_118, %c2_119, %c9_120] : memref<1x1x8x143xf32, #tpu.memory_space<vmem>>, vector<1x1x2x128xf32>
    %76 = vector.shape_cast %75 : vector<1x1x2x128xf32> to vector<2x128xf32>
    %c38 = arith.constant 38 : index
    %c0_121 = arith.constant 0 : index
    %77 = vector.load %arg5[%c38, %c0_121] : memref<128x128xf32, #tpu.memory_space<vmem>>, vector<2x128xf32>
    tpu.vector_store %arg5[%c38, %c0_121], %76 {strides = array<i32>} : memref<128x128xf32, #tpu.memory_space<vmem>>, vector<2x128xf32>,
    %c0_122 = arith.constant 0 : index
    %c0_123 = arith.constant 0 : index
    %c2_124 = arith.constant 2 : index
    %c10_125 = arith.constant 10 : index
    %78 = vector.load %arg2[%c0_122, %c0_123, %c2_124, %c10_125] : memref<1x1x8x143xf32, #tpu.memory_space<vmem>>, vector<1x1x2x128xf32>
    %79 = vector.shape_cast %78 : vector<1x1x2x128xf32> to vector<2x128xf32>
    %c42 = arith.constant 42 : index
    %c0_126 = arith.constant 0 : index
    %80 = vector.load %arg5[%c42, %c0_126] : memref<128x128xf32, #tpu.memory_space<vmem>>, vector<2x128xf32>
    tpu.vector_store %arg5[%c42, %c0_126], %79 {strides = array<i32>} : memref<128x128xf32, #tpu.memory_space<vmem>>, vector<2x128xf32>,
    %c0_127 = arith.constant 0 : index
    %c0_128 = arith.constant 0 : index
    %c2_129 = arith.constant 2 : index
    %c11_130 = arith.constant 11 : index
    %81 = vector.load %arg2[%c0_127, %c0_128, %c2_129, %c11_130] : memref<1x1x8x143xf32, #tpu.memory_space<vmem>>, vector<1x1x2x128xf32>
    %82 = vector.shape_cast %81 : vector<1x1x2x128xf32> to vector<2x128xf32>
    %c46 = arith.constant 46 : index
    %c0_131 = arith.constant 0 : index
    %83 = vector.load %arg5[%c46, %c0_131] : memref<128x128xf32, #tpu.memory_space<vmem>>, vector<2x128xf32>
    tpu.vector_store %arg5[%c46, %c0_131], %82 {strides = array<i32>} : memref<128x128xf32, #tpu.memory_space<vmem>>, vector<2x128xf32>,
    %c0_132 = arith.constant 0 : index
    %c0_133 = arith.constant 0 : index
    %c2_134 = arith.constant 2 : index
    %c12_135 = arith.constant 12 : index
    %84 = vector.load %arg2[%c0_132, %c0_133, %c2_134, %c12_135] : memref<1x1x8x143xf32, #tpu.memory_space<vmem>>, vector<1x1x2x128xf32>
    %85 = vector.shape_cast %84 : vector<1x1x2x128xf32> to vector<2x128xf32>
    %c50 = arith.constant 50 : index
    %c0_136 = arith.constant 0 : index
    %86 = vector.load %arg5[%c50, %c0_136] : memref<128x128xf32, #tpu.memory_space<vmem>>, vector<2x128xf32>
    tpu.vector_store %arg5[%c50, %c0_136], %85 {strides = array<i32>} : memref<128x128xf32, #tpu.memory_space<vmem>>, vector<2x128xf32>,
    %c0_137 = arith.constant 0 : index
    %c0_138 = arith.constant 0 : index
    %c2_139 = arith.constant 2 : index
    %c13_140 = arith.constant 13 : index
    %87 = vector.load %arg2[%c0_137, %c0_138, %c2_139, %c13_140] : memref<1x1x8x143xf32, #tpu.memory_space<vmem>>, vector<1x1x2x128xf32>
    %88 = vector.shape_cast %87 : vector<1x1x2x128xf32> to vector<2x128xf32>
    %c54 = arith.constant 54 : index
    %c0_141 = arith.constant 0 : index
    %89 = vector.load %arg5[%c54, %c0_141] : memref<128x128xf32, #tpu.memory_space<vmem>>, vector<2x128xf32>
    tpu.vector_store %arg5[%c54, %c0_141], %88 {strides = array<i32>} : memref<128x128xf32, #tpu.memory_space<vmem>>, vector<2x128xf32>,
    %c0_142 = arith.constant 0 : index
    %c0_143 = arith.constant 0 : index
    %c2_144 = arith.constant 2 : index
    %c14_145 = arith.constant 14 : index
    %90 = vector.load %arg2[%c0_142, %c0_143, %c2_144, %c14_145] : memref<1x1x8x143xf32, #tpu.memory_space<vmem>>, vector<1x1x2x128xf32>
    %91 = vector.shape_cast %90 : vector<1x1x2x128xf32> to vector<2x128xf32>
    %c58 = arith.constant 58 : index
    %c0_146 = arith.constant 0 : index
    %92 = vector.load %arg5[%c58, %c0_146] : memref<128x128xf32, #tpu.memory_space<vmem>>, vector<2x128xf32>
    tpu.vector_store %arg5[%c58, %c0_146], %91 {strides = array<i32>} : memref<128x128xf32, #tpu.memory_space<vmem>>, vector<2x128xf32>,
    %c0_147 = arith.constant 0 : index
    %c0_148 = arith.constant 0 : index
    %c2_149 = arith.constant 2 : index
    %c15_150 = arith.constant 15 : index
    %93 = vector.load %arg2[%c0_147, %c0_148, %c2_149, %c15_150] : memref<1x1x8x143xf32, #tpu.memory_space<vmem>>, vector<1x1x2x128xf32>
    %94 = vector.shape_cast %93 : vector<1x1x2x128xf32> to vector<2x128xf32>
    %c62 = arith.constant 62 : index
    %c0_151 = arith.constant 0 : index
    %95 = vector.load %arg5[%c62, %c0_151] : memref<128x128xf32, #tpu.memory_space<vmem>>, vector<2x128xf32>
    tpu.vector_store %arg5[%c62, %c0_151], %94 {strides = array<i32>} : memref<128x128xf32, #tpu.memory_space<vmem>>, vector<2x128xf32>,
    %c0_152 = arith.constant 0 : index
    %c0_153 = arith.constant 0 : index
    %c4_154 = arith.constant 4 : index
    %c0_155 = arith.constant 0 : index
    %96 = vector.load %arg2[%c0_152, %c0_153, %c4_154, %c0_155] : memref<1x1x8x143xf32, #tpu.memory_space<vmem>>, vector<1x1x2x128xf32>
    %97 = vector.shape_cast %96 : vector<1x1x2x128xf32> to vector<2x128xf32>
    %c64 = arith.constant 64 : index
    %c0_156 = arith.constant 0 : index
    %98 = vector.load %arg5[%c64, %c0_156] : memref<128x128xf32, #tpu.memory_space<vmem>>, vector<2x128xf32>
    tpu.vector_store %arg5[%c64, %c0_156], %97 {strides = array<i32>} : memref<128x128xf32, #tpu.memory_space<vmem>>, vector<2x128xf32>,
    %c0_157 = arith.constant 0 : index
    %c0_158 = arith.constant 0 : index
    %c4_159 = arith.constant 4 : index
    %c1_160 = arith.constant 1 : index
    %99 = vector.load %arg2[%c0_157, %c0_158, %c4_159, %c1_160] : memref<1x1x8x143xf32, #tpu.memory_space<vmem>>, vector<1x1x2x128xf32>
    %100 = vector.shape_cast %99 : vector<1x1x2x128xf32> to vector<2x128xf32>
    %c68 = arith.constant 68 : index
    %c0_161 = arith.constant 0 : index
    %101 = vector.load %arg5[%c68, %c0_161] : memref<128x128xf32, #tpu.memory_space<vmem>>, vector<2x128xf32>
    tpu.vector_store %arg5[%c68, %c0_161], %100 {strides = array<i32>} : memref<128x128xf32, #tpu.memory_space<vmem>>, vector<2x128xf32>,
    %c0_162 = arith.constant 0 : index
    %c0_163 = arith.constant 0 : index
    %c4_164 = arith.constant 4 : index
    %c2_165 = arith.constant 2 : index
    %102 = vector.load %arg2[%c0_162, %c0_163, %c4_164, %c2_165] : memref<1x1x8x143xf32, #tpu.memory_space<vmem>>, vector<1x1x2x128xf32>
    %103 = vector.shape_cast %102 : vector<1x1x2x128xf32> to vector<2x128xf32>
    %c72 = arith.constant 72 : index
    %c0_166 = arith.constant 0 : index
    %104 = vector.load %arg5[%c72, %c0_166] : memref<128x128xf32, #tpu.memory_space<vmem>>, vector<2x128xf32>
    tpu.vector_store %arg5[%c72, %c0_166], %103 {strides = array<i32>} : memref<128x128xf32, #tpu.memory_space<vmem>>, vector<2x128xf32>,
    %c0_167 = arith.constant 0 : index
    %c0_168 = arith.constant 0 : index
    %c4_169 = arith.constant 4 : index
    %c3_170 = arith.constant 3 : index
    %105 = vector.load %arg2[%c0_167, %c0_168, %c4_169, %c3_170] : memref<1x1x8x143xf32, #tpu.memory_space<vmem>>, vector<1x1x2x128xf32>
    %106 = vector.shape_cast %105 : vector<1x1x2x128xf32> to vector<2x128xf32>
    %c76 = arith.constant 76 : index
    %c0_171 = arith.constant 0 : index
    %107 = vector.load %arg5[%c76, %c0_171] : memref<128x128xf32, #tpu.memory_space<vmem>>, vector<2x128xf32>
    tpu.vector_store %arg5[%c76, %c0_171], %106 {strides = array<i32>} : memref<128x128xf32, #tpu.memory_space<vmem>>, vector<2x128xf32>,
    %c0_172 = arith.constant 0 : index
    %c0_173 = arith.constant 0 : index
    %c4_174 = arith.constant 4 : index
    %c4_175 = arith.constant 4 : index
    %108 = vector.load %arg2[%c0_172, %c0_173, %c4_174, %c4_175] : memref<1x1x8x143xf32, #tpu.memory_space<vmem>>, vector<1x1x2x128xf32>
    %109 = vector.shape_cast %108 : vector<1x1x2x128xf32> to vector<2x128xf32>
    %c80 = arith.constant 80 : index
    %c0_176 = arith.constant 0 : index
    %110 = vector.load %arg5[%c80, %c0_176] : memref<128x128xf32, #tpu.memory_space<vmem>>, vector<2x128xf32>
    tpu.vector_store %arg5[%c80, %c0_176], %109 {strides = array<i32>} : memref<128x128xf32, #tpu.memory_space<vmem>>, vector<2x128xf32>,
    %c0_177 = arith.constant 0 : index
    %c0_178 = arith.constant 0 : index
    %c4_179 = arith.constant 4 : index
    %c5_180 = arith.constant 5 : index
    %111 = vector.load %arg2[%c0_177, %c0_178, %c4_179, %c5_180] : memref<1x1x8x143xf32, #tpu.memory_space<vmem>>, vector<1x1x2x128xf32>
    %112 = vector.shape_cast %111 : vector<1x1x2x128xf32> to vector<2x128xf32>
    %c84 = arith.constant 84 : index
    %c0_181 = arith.constant 0 : index
    %113 = vector.load %arg5[%c84, %c0_181] : memref<128x128xf32, #tpu.memory_space<vmem>>, vector<2x128xf32>
    tpu.vector_store %arg5[%c84, %c0_181], %112 {strides = array<i32>} : memref<128x128xf32, #tpu.memory_space<vmem>>, vector<2x128xf32>,
    %c0_182 = arith.constant 0 : index
    %c0_183 = arith.constant 0 : index
    %c4_184 = arith.constant 4 : index
    %c6_185 = arith.constant 6 : index
    %114 = vector.load %arg2[%c0_182, %c0_183, %c4_184, %c6_185] : memref<1x1x8x143xf32, #tpu.memory_space<vmem>>, vector<1x1x2x128xf32>
    %115 = vector.shape_cast %114 : vector<1x1x2x128xf32> to vector<2x128xf32>
    %c88 = arith.constant 88 : index
    %c0_186 = arith.constant 0 : index
    %116 = vector.load %arg5[%c88, %c0_186] : memref<128x128xf32, #tpu.memory_space<vmem>>, vector<2x128xf32>
    tpu.vector_store %arg5[%c88, %c0_186], %115 {strides = array<i32>} : memref<128x128xf32, #tpu.memory_space<vmem>>, vector<2x128xf32>,
    %c0_187 = arith.constant 0 : index
    %c0_188 = arith.constant 0 : index
    %c4_189 = arith.constant 4 : index
    %c7_190 = arith.constant 7 : index
    %117 = vector.load %arg2[%c0_187, %c0_188, %c4_189, %c7_190] : memref<1x1x8x143xf32, #tpu.memory_space<vmem>>, vector<1x1x2x128xf32>
    %118 = vector.shape_cast %117 : vector<1x1x2x128xf32> to vector<2x128xf32>
    %c92 = arith.constant 92 : index
    %c0_191 = arith.constant 0 : index
    %119 = vector.load %arg5[%c92, %c0_191] : memref<128x128xf32, #tpu.memory_space<vmem>>, vector<2x128xf32>
    tpu.vector_store %arg5[%c92, %c0_191], %118 {strides = array<i32>} : memref<128x128xf32, #tpu.memory_space<vmem>>, vector<2x128xf32>,
    %c0_192 = arith.constant 0 : index
    %c0_193 = arith.constant 0 : index
    %c4_194 = arith.constant 4 : index
    %c8_195 = arith.constant 8 : index
    %120 = vector.load %arg2[%c0_192, %c0_193, %c4_194, %c8_195] : memref<1x1x8x143xf32, #tpu.memory_space<vmem>>, vector<1x1x2x128xf32>
    %121 = vector.shape_cast %120 : vector<1x1x2x128xf32> to vector<2x128xf32>
    %c96 = arith.constant 96 : index
    %c0_196 = arith.constant 0 : index
    %122 = vector.load %arg5[%c96, %c0_196] : memref<128x128xf32, #tpu.memory_space<vmem>>, vector<2x128xf32>
    tpu.vector_store %arg5[%c96, %c0_196], %121 {strides = array<i32>} : memref<128x128xf32, #tpu.memory_space<vmem>>, vector<2x128xf32>,
    %c0_197 = arith.constant 0 : index
    %c0_198 = arith.constant 0 : index
    %c4_199 = arith.constant 4 : index
    %c9_200 = arith.constant 9 : index
    %123 = vector.load %arg2[%c0_197, %c0_198, %c4_199, %c9_200] : memref<1x1x8x143xf32, #tpu.memory_space<vmem>>, vector<1x1x2x128xf32>
    %124 = vector.shape_cast %123 : vector<1x1x2x128xf32> to vector<2x128xf32>
    %c100 = arith.constant 100 : index
    %c0_201 = arith.constant 0 : index
    %125 = vector.load %arg5[%c100, %c0_201] : memref<128x128xf32, #tpu.memory_space<vmem>>, vector<2x128xf32>
    tpu.vector_store %arg5[%c100, %c0_201], %124 {strides = array<i32>} : memref<128x128xf32, #tpu.memory_space<vmem>>, vector<2x128xf32>,
    %c0_202 = arith.constant 0 : index
    %c0_203 = arith.constant 0 : index
    %c4_204 = arith.constant 4 : index
    %c10_205 = arith.constant 10 : index
    %126 = vector.load %arg2[%c0_202, %c0_203, %c4_204, %c10_205] : memref<1x1x8x143xf32, #tpu.memory_space<vmem>>, vector<1x1x2x128xf32>
    %127 = vector.shape_cast %126 : vector<1x1x2x128xf32> to vector<2x128xf32>
    %c104 = arith.constant 104 : index
    %c0_206 = arith.constant 0 : index
    %128 = vector.load %arg5[%c104, %c0_206] : memref<128x128xf32, #tpu.memory_space<vmem>>, vector<2x128xf32>
    tpu.vector_store %arg5[%c104, %c0_206], %127 {strides = array<i32>} : memref<128x128xf32, #tpu.memory_space<vmem>>, vector<2x128xf32>,
    %c0_207 = arith.constant 0 : index
    %c0_208 = arith.constant 0 : index
    %c4_209 = arith.constant 4 : index
    %c11_210 = arith.constant 11 : index
    %129 = vector.load %arg2[%c0_207, %c0_208, %c4_209, %c11_210] : memref<1x1x8x143xf32, #tpu.memory_space<vmem>>, vector<1x1x2x128xf32>
    %130 = vector.shape_cast %129 : vector<1x1x2x128xf32> to vector<2x128xf32>
    %c108 = arith.constant 108 : index
    %c0_211 = arith.constant 0 : index
    %131 = vector.load %arg5[%c108, %c0_211] : memref<128x128xf32, #tpu.memory_space<vmem>>, vector<2x128xf32>
    tpu.vector_store %arg5[%c108, %c0_211], %130 {strides = array<i32>} : memref<128x128xf32, #tpu.memory_space<vmem>>, vector<2x128xf32>,
    %c0_212 = arith.constant 0 : index
    %c0_213 = arith.constant 0 : index
    %c4_214 = arith.constant 4 : index
    %c12_215 = arith.constant 12 : index
    %132 = vector.load %arg2[%c0_212, %c0_213, %c4_214, %c12_215] : memref<1x1x8x143xf32, #tpu.memory_space<vmem>>, vector<1x1x2x128xf32>
    %133 = vector.shape_cast %132 : vector<1x1x2x128xf32> to vector<2x128xf32>
    %c112 = arith.constant 112 : index
    %c0_216 = arith.constant 0 : index
    %134 = vector.load %arg5[%c112, %c0_216] : memref<128x128xf32, #tpu.memory_space<vmem>>, vector<2x128xf32>
    tpu.vector_store %arg5[%c112, %c0_216], %133 {strides = array<i32>} : memref<128x128xf32, #tpu.memory_space<vmem>>, vector<2x128xf32>,
    %c0_217 = arith.constant 0 : index
    %c0_218 = arith.constant 0 : index
    %c4_219 = arith.constant 4 : index
    %c13_220 = arith.constant 13 : index
    %135 = vector.load %arg2[%c0_217, %c0_218, %c4_219, %c13_220] : memref<1x1x8x143xf32, #tpu.memory_space<vmem>>, vector<1x1x2x128xf32>
    %136 = vector.shape_cast %135 : vector<1x1x2x128xf32> to vector<2x128xf32>
    %c116 = arith.constant 116 : index
    %c0_221 = arith.constant 0 : index
    %137 = vector.load %arg5[%c116, %c0_221] : memref<128x128xf32, #tpu.memory_space<vmem>>, vector<2x128xf32>
    tpu.vector_store %arg5[%c116, %c0_221], %136 {strides = array<i32>} : memref<128x128xf32, #tpu.memory_space<vmem>>, vector<2x128xf32>,
    %c0_222 = arith.constant 0 : index
    %c0_223 = arith.constant 0 : index
    %c4_224 = arith.constant 4 : index
    %c14_225 = arith.constant 14 : index
    %138 = vector.load %arg2[%c0_222, %c0_223, %c4_224, %c14_225] : memref<1x1x8x143xf32, #tpu.memory_space<vmem>>, vector<1x1x2x128xf32>
    %139 = vector.shape_cast %138 : vector<1x1x2x128xf32> to vector<2x128xf32>
    %c120 = arith.constant 120 : index
    %c0_226 = arith.constant 0 : index
    %140 = vector.load %arg5[%c120, %c0_226] : memref<128x128xf32, #tpu.memory_space<vmem>>, vector<2x128xf32>
    tpu.vector_store %arg5[%c120, %c0_226], %139 {strides = array<i32>} : memref<128x128xf32, #tpu.memory_space<vmem>>, vector<2x128xf32>,
    %c0_227 = arith.constant 0 : index
    %c0_228 = arith.constant 0 : index
    %c4_229 = arith.constant 4 : index
    %c15_230 = arith.constant 15 : index
    %141 = vector.load %arg2[%c0_227, %c0_228, %c4_229, %c15_230] : memref<1x1x8x143xf32, #tpu.memory_space<vmem>>, vector<1x1x2x128xf32>
    %142 = vector.shape_cast %141 : vector<1x1x2x128xf32> to vector<2x128xf32>
    %c124 = arith.constant 124 : index
    %c0_231 = arith.constant 0 : index
    %143 = vector.load %arg5[%c124, %c0_231] : memref<128x128xf32, #tpu.memory_space<vmem>>, vector<2x128xf32>
    tpu.vector_store %arg5[%c124, %c0_231], %142 {strides = array<i32>} : memref<128x128xf32, #tpu.memory_space<vmem>>, vector<2x128xf32>,
    %c0_232 = arith.constant 0 : index
    %c0_233 = arith.constant 0 : index
    %c6_234 = arith.constant 6 : index
    %c0_235 = arith.constant 0 : index
    %144 = vector.load %arg2[%c0_232, %c0_233, %c6_234, %c0_235] : memref<1x1x8x143xf32, #tpu.memory_space<vmem>>, vector<1x1x2x128xf32>
    %145 = vector.shape_cast %144 : vector<1x1x2x128xf32> to vector<2x128xf32>
    %c66 = arith.constant 66 : index
    %c0_236 = arith.constant 0 : index
    %146 = vector.load %arg5[%c66, %c0_236] : memref<128x128xf32, #tpu.memory_space<vmem>>, vector<2x128xf32>
    tpu.vector_store %arg5[%c66, %c0_236], %145 {strides = array<i32>} : memref<128x128xf32, #tpu.memory_space<vmem>>, vector<2x128xf32>,
    %c0_237 = arith.constant 0 : index
    %c0_238 = arith.constant 0 : index
    %c6_239 = arith.constant 6 : index
    %c1_240 = arith.constant 1 : index
    %147 = vector.load %arg2[%c0_237, %c0_238, %c6_239, %c1_240] : memref<1x1x8x143xf32, #tpu.memory_space<vmem>>, vector<1x1x2x128xf32>
    %148 = vector.shape_cast %147 : vector<1x1x2x128xf32> to vector<2x128xf32>
    %c70 = arith.constant 70 : index
    %c0_241 = arith.constant 0 : index
    %149 = vector.load %arg5[%c70, %c0_241] : memref<128x128xf32, #tpu.memory_space<vmem>>, vector<2x128xf32>
    tpu.vector_store %arg5[%c70, %c0_241], %148 {strides = array<i32>} : memref<128x128xf32, #tpu.memory_space<vmem>>, vector<2x128xf32>,
    %c0_242 = arith.constant 0 : index
    %c0_243 = arith.constant 0 : index
    %c6_244 = arith.constant 6 : index
    %c2_245 = arith.constant 2 : index
    %150 = vector.load %arg2[%c0_242, %c0_243, %c6_244, %c2_245] : memref<1x1x8x143xf32, #tpu.memory_space<vmem>>, vector<1x1x2x128xf32>
    %151 = vector.shape_cast %150 : vector<1x1x2x128xf32> to vector<2x128xf32>
    %c74 = arith.constant 74 : index
    %c0_246 = arith.constant 0 : index
    %152 = vector.load %arg5[%c74, %c0_246] : memref<128x128xf32, #tpu.memory_space<vmem>>, vector<2x128xf32>
    tpu.vector_store %arg5[%c74, %c0_246], %151 {strides = array<i32>} : memref<128x128xf32, #tpu.memory_space<vmem>>, vector<2x128xf32>,
    %c0_247 = arith.constant 0 : index
    %c0_248 = arith.constant 0 : index
    %c6_249 = arith.constant 6 : index
    %c3_250 = arith.constant 3 : index
    %153 = vector.load %arg2[%c0_247, %c0_248, %c6_249, %c3_250] : memref<1x1x8x143xf32, #tpu.memory_space<vmem>>, vector<1x1x2x128xf32>
    %154 = vector.shape_cast %153 : vector<1x1x2x128xf32> to vector<2x128xf32>
    %c78 = arith.constant 78 : index
    %c0_251 = arith.constant 0 : index
    %155 = vector.load %arg5[%c78, %c0_251] : memref<128x128xf32, #tpu.memory_space<vmem>>, vector<2x128xf32>
    tpu.vector_store %arg5[%c78, %c0_251], %154 {strides = array<i32>} : memref<128x128xf32, #tpu.memory_space<vmem>>, vector<2x128xf32>,
    %c0_252 = arith.constant 0 : index
    %c0_253 = arith.constant 0 : index
    %c6_254 = arith.constant 6 : index
    %c4_255 = arith.constant 4 : index
    %156 = vector.load %arg2[%c0_252, %c0_253, %c6_254, %c4_255] : memref<1x1x8x143xf32, #tpu.memory_space<vmem>>, vector<1x1x2x128xf32>
    %157 = vector.shape_cast %156 : vector<1x1x2x128xf32> to vector<2x128xf32>
    %c82 = arith.constant 82 : index
    %c0_256 = arith.constant 0 : index
    %158 = vector.load %arg5[%c82, %c0_256] : memref<128x128xf32, #tpu.memory_space<vmem>>, vector<2x128xf32>
    tpu.vector_store %arg5[%c82, %c0_256], %157 {strides = array<i32>} : memref<128x128xf32, #tpu.memory_space<vmem>>, vector<2x128xf32>,
    %c0_257 = arith.constant 0 : index
    %c0_258 = arith.constant 0 : index
    %c6_259 = arith.constant 6 : index
    %c5_260 = arith.constant 5 : index
    %159 = vector.load %arg2[%c0_257, %c0_258, %c6_259, %c5_260] : memref<1x1x8x143xf32, #tpu.memory_space<vmem>>, vector<1x1x2x128xf32>
    %160 = vector.shape_cast %159 : vector<1x1x2x128xf32> to vector<2x128xf32>
    %c86 = arith.constant 86 : index
    %c0_261 = arith.constant 0 : index
    %161 = vector.load %arg5[%c86, %c0_261] : memref<128x128xf32, #tpu.memory_space<vmem>>, vector<2x128xf32>
    tpu.vector_store %arg5[%c86, %c0_261], %160 {strides = array<i32>} : memref<128x128xf32, #tpu.memory_space<vmem>>, vector<2x128xf32>,
    %c0_262 = arith.constant 0 : index
    %c0_263 = arith.constant 0 : index
    %c6_264 = arith.constant 6 : index
    %c6_265 = arith.constant 6 : index
    %162 = vector.load %arg2[%c0_262, %c0_263, %c6_264, %c6_265] : memref<1x1x8x143xf32, #tpu.memory_space<vmem>>, vector<1x1x2x128xf32>
    %163 = vector.shape_cast %162 : vector<1x1x2x128xf32> to vector<2x128xf32>
    %c90 = arith.constant 90 : index
    %c0_266 = arith.constant 0 : index
    %164 = vector.load %arg5[%c90, %c0_266] : memref<128x128xf32, #tpu.memory_space<vmem>>, vector<2x128xf32>
    tpu.vector_store %arg5[%c90, %c0_266], %163 {strides = array<i32>} : memref<128x128xf32, #tpu.memory_space<vmem>>, vector<2x128xf32>,
    %c0_267 = arith.constant 0 : index
    %c0_268 = arith.constant 0 : index
    %c6_269 = arith.constant 6 : index
    %c7_270 = arith.constant 7 : index
    %165 = vector.load %arg2[%c0_267, %c0_268, %c6_269, %c7_270] : memref<1x1x8x143xf32, #tpu.memory_space<vmem>>, vector<1x1x2x128xf32>
    %166 = vector.shape_cast %165 : vector<1x1x2x128xf32> to vector<2x128xf32>
    %c94 = arith.constant 94 : index
    %c0_271 = arith.constant 0 : index
    %167 = vector.load %arg5[%c94, %c0_271] : memref<128x128xf32, #tpu.memory_space<vmem>>, vector<2x128xf32>
    tpu.vector_store %arg5[%c94, %c0_271], %166 {strides = array<i32>} : memref<128x128xf32, #tpu.memory_space<vmem>>, vector<2x128xf32>,
    %c0_272 = arith.constant 0 : index
    %c0_273 = arith.constant 0 : index
    %c6_274 = arith.constant 6 : index
    %c8_275 = arith.constant 8 : index
    %168 = vector.load %arg2[%c0_272, %c0_273, %c6_274, %c8_275] : memref<1x1x8x143xf32, #tpu.memory_space<vmem>>, vector<1x1x2x128xf32>
    %169 = vector.shape_cast %168 : vector<1x1x2x128xf32> to vector<2x128xf32>
    %c98 = arith.constant 98 : index
    %c0_276 = arith.constant 0 : index
    %170 = vector.load %arg5[%c98, %c0_276] : memref<128x128xf32, #tpu.memory_space<vmem>>, vector<2x128xf32>
    tpu.vector_store %arg5[%c98, %c0_276], %169 {strides = array<i32>} : memref<128x128xf32, #tpu.memory_space<vmem>>, vector<2x128xf32>,
    %c0_277 = arith.constant 0 : index
    %c0_278 = arith.constant 0 : index
    %c6_279 = arith.constant 6 : index
    %c9_280 = arith.constant 9 : index
    %171 = vector.load %arg2[%c0_277, %c0_278, %c6_279, %c9_280] : memref<1x1x8x143xf32, #tpu.memory_space<vmem>>, vector<1x1x2x128xf32>
    %172 = vector.shape_cast %171 : vector<1x1x2x128xf32> to vector<2x128xf32>
    %c102 = arith.constant 102 : index
    %c0_281 = arith.constant 0 : index
    %173 = vector.load %arg5[%c102, %c0_281] : memref<128x128xf32, #tpu.memory_space<vmem>>, vector<2x128xf32>
    tpu.vector_store %arg5[%c102, %c0_281], %172 {strides = array<i32>} : memref<128x128xf32, #tpu.memory_space<vmem>>, vector<2x128xf32>,
    %c0_282 = arith.constant 0 : index
    %c0_283 = arith.constant 0 : index
    %c6_284 = arith.constant 6 : index
    %c10_285 = arith.constant 10 : index
    %174 = vector.load %arg2[%c0_282, %c0_283, %c6_284, %c10_285] : memref<1x1x8x143xf32, #tpu.memory_space<vmem>>, vector<1x1x2x128xf32>
    %175 = vector.shape_cast %174 : vector<1x1x2x128xf32> to vector<2x128xf32>
    %c106 = arith.constant 106 : index
    %c0_286 = arith.constant 0 : index
    %176 = vector.load %arg5[%c106, %c0_286] : memref<128x128xf32, #tpu.memory_space<vmem>>, vector<2x128xf32>
    tpu.vector_store %arg5[%c106, %c0_286], %175 {strides = array<i32>} : memref<128x128xf32, #tpu.memory_space<vmem>>, vector<2x128xf32>,
    %c0_287 = arith.constant 0 : index
    %c0_288 = arith.constant 0 : index
    %c6_289 = arith.constant 6 : index
    %c11_290 = arith.constant 11 : index
    %177 = vector.load %arg2[%c0_287, %c0_288, %c6_289, %c11_290] : memref<1x1x8x143xf32, #tpu.memory_space<vmem>>, vector<1x1x2x128xf32>
    %178 = vector.shape_cast %177 : vector<1x1x2x128xf32> to vector<2x128xf32>
    %c110 = arith.constant 110 : index
    %c0_291 = arith.constant 0 : index
    %179 = vector.load %arg5[%c110, %c0_291] : memref<128x128xf32, #tpu.memory_space<vmem>>, vector<2x128xf32>
    tpu.vector_store %arg5[%c110, %c0_291], %178 {strides = array<i32>} : memref<128x128xf32, #tpu.memory_space<vmem>>, vector<2x128xf32>,
    %c0_292 = arith.constant 0 : index
    %c0_293 = arith.constant 0 : index
    %c6_294 = arith.constant 6 : index
    %c12_295 = arith.constant 12 : index
    %180 = vector.load %arg2[%c0_292, %c0_293, %c6_294, %c12_295] : memref<1x1x8x143xf32, #tpu.memory_space<vmem>>, vector<1x1x2x128xf32>
    %181 = vector.shape_cast %180 : vector<1x1x2x128xf32> to vector<2x128xf32>
    %c114 = arith.constant 114 : index
    %c0_296 = arith.constant 0 : index
    %182 = vector.load %arg5[%c114, %c0_296] : memref<128x128xf32, #tpu.memory_space<vmem>>, vector<2x128xf32>
    tpu.vector_store %arg5[%c114, %c0_296], %181 {strides = array<i32>} : memref<128x128xf32, #tpu.memory_space<vmem>>, vector<2x128xf32>,
    %c0_297 = arith.constant 0 : index
    %c0_298 = arith.constant 0 : index
    %c6_299 = arith.constant 6 : index
    %c13_300 = arith.constant 13 : index
    %183 = vector.load %arg2[%c0_297, %c0_298, %c6_299, %c13_300] : memref<1x1x8x143xf32, #tpu.memory_space<vmem>>, vector<1x1x2x128xf32>
    %184 = vector.shape_cast %183 : vector<1x1x2x128xf32> to vector<2x128xf32>
    %c118 = arith.constant 118 : index
    %c0_301 = arith.constant 0 : index
    %185 = vector.load %arg5[%c118, %c0_301] : memref<128x128xf32, #tpu.memory_space<vmem>>, vector<2x128xf32>
    tpu.vector_store %arg5[%c118, %c0_301], %184 {strides = array<i32>} : memref<128x128xf32, #tpu.memory_space<vmem>>, vector<2x128xf32>,
    %c0_302 = arith.constant 0 : index
    %c0_303 = arith.constant 0 : index
    %c6_304 = arith.constant 6 : index
    %c14_305 = arith.constant 14 : index
    %186 = vector.load %arg2[%c0_302, %c0_303, %c6_304, %c14_305] : memref<1x1x8x143xf32, #tpu.memory_space<vmem>>, vector<1x1x2x128xf32>
    %187 = vector.shape_cast %186 : vector<1x1x2x128xf32> to vector<2x128xf32>
    %c122 = arith.constant 122 : index
    %c0_306 = arith.constant 0 : index
    %188 = vector.load %arg5[%c122, %c0_306] : memref<128x128xf32, #tpu.memory_space<vmem>>, vector<2x128xf32>
    tpu.vector_store %arg5[%c122, %c0_306], %187 {strides = array<i32>} : memref<128x128xf32, #tpu.memory_space<vmem>>, vector<2x128xf32>,
    %c0_307 = arith.constant 0 : index
    %c0_308 = arith.constant 0 : index
    %c6_309 = arith.constant 6 : index
    %c15_310 = arith.constant 15 : index
    %189 = vector.load %arg2[%c0_307, %c0_308, %c6_309, %c15_310] : memref<1x1x8x143xf32, #tpu.memory_space<vmem>>, vector<1x1x2x128xf32>
    %190 = vector.shape_cast %189 : vector<1x1x2x128xf32> to vector<2x128xf32>
    %c126 = arith.constant 126 : index
    %c0_311 = arith.constant 0 : index
    %191 = vector.load %arg5[%c126, %c0_311] : memref<128x128xf32, #tpu.memory_space<vmem>>, vector<2x128xf32>
    tpu.vector_store %arg5[%c126, %c0_311], %190 {strides = array<i32>} : memref<128x128xf32, #tpu.memory_space<vmem>>, vector<2x128xf32>,
    %c0_312 = arith.constant 0 : index
    %c0_313 = arith.constant 0 : index
    %192 = vector.load %arg3[%c0_312, %c0_313] : memref<8x128xf32, #tpu.memory_space<vmem>>, vector<8x128xf32>
    %c0_314 = arith.constant 0 : index
    %c0_315 = arith.constant 0 : index
    %193 = vector.load %arg5[%c0_314, %c0_315] : memref<128x128xf32, #tpu.memory_space<vmem>>, vector<128x128xf32>
    %cst = arith.constant dense<0.000000e+00> : vector<8x128xf32>
    %194 = tpu.matmul %192, %193, %cst {dimension_numbers = #tpu.dot_dimension_numbers<[1], [0], [0], [1], [0, 0, 1, 1], [], []>} : vector<8x128xf32>, vector<128x128xf32>, vector<8x128xf32> -> vector<8x128xf32>
    %c0_316 = arith.constant 0 : index
    %c0_317 = arith.constant 0 : index
    %c0_318 = arith.constant 0 : index
    %195 = vector.load %arg4[%c0_316, %c0_317, %c0_318] : memref<1x8x128xf32, #tpu.memory_space<vmem>>, vector<1x8x128xf32>
    %196 = vector.shape_cast %195 : vector<1x8x128xf32> to vector<8x128xf32>
    %197 = vector.shape_cast %194 : vector<8x128xf32> to vector<1x8x128xf32>
    tpu.vector_store %arg4[%c0_316, %c0_317, %c0_318], %197 {strides = array<i32>} : memref<1x8x128xf32, #tpu.memory_space<vmem>>, vector<1x8x128xf32>,
    return
  }
  func.func @transform_0(%arg0: i32, %arg1: i32) -> (i32, i32, i32, i32) {
    %c0_i32 = arith.constant 0 : i32
    %c0_i32_0 = arith.constant 0 : i32
    %c0_i32_1 = arith.constant 0 : i32
    return %arg0, %arg1, %c0_i32, %c0_i32_0 : i32, i32, i32, i32
  }
  func.func @transform_1(%arg0: i32, %arg1: i32) -> (i32, i32) {
    %c0_i32 = arith.constant 0 : i32
    %c0_i32_0 = arith.constant 0 : i32
    %c0_i32_1 = arith.constant 0 : i32
    return %c0_i32, %c0_i32_0 : i32, i32
  }
  func.func @transform_2(%arg0: i32, %arg1: i32) -> (i32, i32, i32) {
    %c0_i32 = arith.constant 0 : i32
    %c0_i32_0 = arith.constant 0 : i32
    return %arg0, %c0_i32, %arg1 : i32, i32, i32
  }
}

</mosaic_0001>

<bundles_post_ra>
// kernel: custom-call.1
= control target key start
LH: loop header
LB: loop body
LE: loop exit
PB: predicated region body
PF: predicated region fallthrough
CT: control target
= control target key end

     0   :  { %s59_s0 = inlined_call_operand.hbm [shape: c64[2,96,2], index: 0, kind: input, shape index: {}]   ;;  %s60_s1 = inlined_call_operand.vmem [shape: f32[2,96,2], index: 1, kind: output, shape index: {}]  }
   0x1   :  { %s2_s8 = scalar_lea.hbm %s59_s0, 64 }
   0x2   :  { %3 = vsyncpa [#allocation0], 0  ;;  %s4_s11 = sshll.u32 %s60_s1, 4  ;;  %s34_s14 = scalar_lea.hbm %s59_s0, 128  ;;  %s5_s11 = int_to_ptr.vmem [resolvable:$true] %s4_s11 }
   0x3   :  { %p11_p0 = scmp.ne.s32.totalorder %s2_s8, %s34_s14  ;;  %p13_p1 = scmp.lt.u32.totalorder %s2_s8, %s59_s0 }
   0x4   :  { %p14_p2 = scmp.lt.u32.totalorder %s34_s14, %s34_s14  ;;  %p16_p4 = scmp.lt.u32.totalorder %s34_s14, %s2_s8 }
   0x6   :  { %p15_p3 = por %p14_p2, %p13_p1 }
   0x8   :  { %p17_p5 = por %p16_p4, %p15_p3 }
   0xa   :  { %p18_p6 = pnand %p17_p5, %p11_p0 }
   0xc   :  { %21 = shalt.err (!%p18_p6)  }
   0xd   :  { %s22_s17 = scalar_lea.vmem %s5_s11, 64  ;;  %p27_p8 = scmp.lt.s32.totalorder %s5_s11, %s5_s11 }
   0xe   :  { %p23_p7 = scmp.ne.s32.totalorder %s5_s11, %s22_s17  ;;  %p28_p9 = scmp.lt.s32.totalorder %s22_s17, %s22_s17 }
  0x10   :  { %p29_p10 = por %p28_p9, %p27_p8 }
  0x12   :  { %p30_p11 = pnand %p29_p10, %p23_p7 }
  0x14   :  { %33 = shalt.err (!%p30_p11)  }
  0x15   :  { %7 = dma.hbm_to_vmem [thread:$0]  %s2_s8, 64, %s5_s11, [#allocation0] }
  0x16   :  { %35 = dma.done.wait [#allocation0], 64  }
  0x17   :  { %36 = vsyncadd [#allocation0], 4294967232 }
  0x18   :  { %9 = vsyncpa [#allocation0], 1 }

// kernel: custom-call
= control target key start
LH: loop header
LB: loop body
LE: loop exit
PB: predicated region body
PF: predicated region fallthrough
CT: control target
= control target key end

     0   :  { %2 = vsyncpa [#allocation0], 0  ;;  %s61_s0 = inlined_call_operand.hbm [shape: c64[2,96,2], index: 0, kind: input, shape index: {}]   ;;  %s62_s1 = inlined_call_operand.vmem [shape: f32[2,96,2], index: 1, kind: output, shape index: {}]  }
   0x1   :  { %s3_s8 = sshll.u32 %s62_s1, 4  ;;  %s9_s11 = scalar_lea.hbm %s61_s0, 64  ;;  %s4_s8 = int_to_ptr.vmem [resolvable:$true] %s3_s8 }
   0x2   :  { %p10_p0 = scmp.ne.s32.totalorder %s61_s0, %s9_s11  ;;  %s11_s16 = scalar_lea.hbm %s61_s0, 128 }
   0x3   :  { %p12_p1 = scmp.lt.u32.totalorder %s11_s16, %s9_s11  ;;  %p13_p2 = scmp.lt.u32.totalorder %s9_s11, %s61_s0 }
   0x5   :  { %p14_p3 = por %p13_p2, %p12_p1 }
   0x7   :  { %p15_p4 = pnand %p14_p3, %p10_p0 }
   0x9   :  { %18 = shalt.err (!%p15_p4)  }
   0xa   :  { %s19_s1 = scalar_lea.vmem %s4_s8, 64  ;;  %p24_p6 = scmp.lt.s32.totalorder %s4_s8, %s4_s8 }
   0xb   :  { %p20_p5 = scmp.ne.s32.totalorder %s4_s8, %s19_s1  ;;  %p25_p7 = scmp.lt.s32.totalorder %s19_s1, %s19_s1 }
   0xd   :  { %p26_p8 = por %p25_p7, %p24_p6 }
   0xf   :  { %p27_p9 = pnand %p26_p8, %p20_p5 }
  0x11   :  { %30 = shalt.err (!%p27_p9)  }
  0x12   :  { %6 = dma.hbm_to_vmem [thread:$0]  %s61_s0, 64, %s4_s8, [#allocation0] }
  0x13   :  { %31 = dma.done.wait [#allocation0], 64  }
  0x14   :  { %32 = vsyncadd [#allocation0], 4294967232 }
  0x15   :  { %8 = vsyncpa [#allocation0], 1 }

// kernel: neg.1
= control target key start
LH: loop header
LB: loop body
LE: loop exit
PB: predicated region body
PF: predicated region fallthrough
CT: control target
= control target key end

     0   :  { %s24_s0 = inlined_call_operand.vmem [shape: f32[2,64], index: 0, kind: input, shape index: {}]   ;;  %s25_s1 = inlined_call_operand.vmem [shape: f32[2,64], index: 1, kind: output, shape index: {}]  }
   0x1   :  { %v2_v0 = vld [vmem:[%s24_s0] sm:$0x3] }
   0x2   :  { %v5_v1 = vxor.u32 2147483648, %v2_v0 }
   0x4   :  { %7 = vst [vmem:[%s25_s1] sm:$0x3] %v5_v1 }

// kernel: custom-call.2
= control target key start
LH: loop header
LB: loop body
LE: loop exit
PB: predicated region body
PF: predicated region fallthrough
CT: control target
= control target key end

     0   :  { %s126_s0 = inlined_call_operand.vmem [shape: f32[2,33,2], index: 0, kind: input, shape index: {}]   ;;  %s127_s1 = inlined_call_operand.vmem [shape: f32[2,33,2], index: 1, kind: input, shape index: {}]   ;;  %s128_s2 = inlined_call_operand.hbm [shape: c64[2,33,2], index: 2, kind: output, shape index: {}]  }
   0x1   :  { %s87_s11 = scalar_lea.hbm %s128_s2, 64 }
   0x2   :  { %4 = vsyncpa [#allocation0], 0  ;;  %s5_s14 = sshll.u32 %s126_s0, 4  ;;  %s6_s14 = int_to_ptr.vmem [resolvable:$true] %s5_s14 }
   0x3   :  { %s18_s15 = scalar_lea.vmem %s6_s14, 64  ;;  %p23_p1 = scmp.lt.s32.totalorder %s6_s14, %s6_s14 }
   0x4   :  { %p19_p0 = scmp.ne.s32.totalorder %s6_s14, %s18_s15  ;;  %p24_p2 = scmp.lt.s32.totalorder %s18_s15, %s18_s15 }
   0x6   :  { %p25_p3 = por %p24_p2, %p23_p1 }
   0x8   :  { %p26_p4 = pnand %p25_p3, %p19_p0 }
   0xa   :  { %29 = shalt.err (!%p26_p4)  }
   0xb   :  { %p31_p5 = scmp.ne.s32.totalorder %s128_s2, %s87_s11  ;;  %s32_s0 = scalar_lea.hbm %s128_s2, 128 }
   0xc   :  { %p33_p6 = scmp.lt.u32.totalorder %s32_s0, %s87_s11  ;;  %p34_p7 = scmp.lt.u32.totalorder %s87_s11, %s128_s2 }
   0xe   :  { %p35_p8 = por %p34_p7, %p33_p6 }
  0x10   :  { %p36_p9 = pnand %p35_p8, %p31_p5 }
  0x12   :  { %39 = shalt.err (!%p36_p9)  }
  0x13   :  { %8 = dma.vmem_to_hbm [thread:$0]  %s6_s14, 64, %s128_s2, [#allocation0] }
  0x14   :  { %65 = dma.done.wait [#allocation0], 64  }
  0x15   :  { %66 = vsyncadd [#allocation0], 4294967232 }
  0x16   :  { %10 = vsyncpa [#allocation0], 1 }
  0x17   :  { %11 = vsyncpa [#allocation1], 0  ;;  %s12_s28 = sshll.u32 %s127_s1, 4  ;;  %s13_s28 = int_to_ptr.vmem [resolvable:$true] %s12_s28 }
  0x18   :  { %s40_s29 = scalar_lea.vmem %s13_s28, 64  ;;  %p45_p11 = scmp.lt.s32.totalorder %s13_s28, %s13_s28 }
  0x19   :  { %p41_p10 = scmp.ne.s32.totalorder %s13_s28, %s40_s29  ;;  %p46_p12 = scmp.lt.s32.totalorder %s40_s29, %s40_s29 }
  0x1b   :  { %p47_p13 = por %p46_p12, %p45_p11 }
  0x1d   :  { %p48_p0 = pnand %p47_p13, %p41_p10 }
  0x1f   :  { %51 = shalt.err (!%p48_p0)  }
  0x20   :  { %p53_p1 = scmp.ne.s32.totalorder %s87_s11, %s32_s0  ;;  %p56_p2 = scmp.lt.u32.totalorder %s32_s0, %s32_s0 }
  0x22   :  { %p57_p3 = por %p56_p2, %p34_p7 }
  0x24   :  { %p59_p4 = por %p57_p3, %p33_p6 }
  0x26   :  { %p60_p5 = pnand %p59_p4, %p53_p1 }
  0x28   :  { %63 = shalt.err (!%p60_p5)  }
  0x29   :  { %15 = dma.vmem_to_hbm [thread:$0]  %s13_s28, 64, %s87_s11, [#allocation1] }
  0x2a   :  { %67 = dma.done.wait [#allocation1], 64  }
  0x2b   :  { %68 = vsyncadd [#allocation1], 4294967232 }
  0x2c   :  { %17 = vsyncpa [#allocation1], 1 }

// kernel: downsamp_forward.1
= control target key start
LH: loop header
LB: loop body
LE: loop exit
PB: predicated region body
PF: predicated region fallthrough
CT: control target
= control target key end

     0   :  { %s1213_s9 = smov 0   ;;  %s1215_s10 = smov 0   ;;  %s1567_s0 = inlined_call_operand.vmem [shape: f32[2,1,8,143], index: 0, kind: input, shape index: {}]   ;;  %s1568_s1 = inlined_call_operand.vmem [shape: f32[8,128], index: 1, kind: input, shape index: {}]   ;;  %s1569_s2 = inlined_call_operand.vmem [shape: f32[2,8,128], index: 2, kind: output, shape index: {}]  }
   0x1   :  { %s1217_s11 = smov 0  }
   0x2 LB: > { %s24_s12 = sadd.s32 1, %s1174_s10  ;;  %p1031_p0 = scmp.ge.s32.totalorder %s1178_s11, 1  ;;  %s1178_s11 = sphi %s1217_s11, %s12_s11   ;;  %s1174_s10 = sphi %s1215_s10, %s1571_s10   ;;  %s1170_s9 = sphi %s1213_s9, %s1570_s9  }
   0x3   : > { %p26_p1 = scmp.ge.s32.totalorder %s24_s12, 2  ;;  %p132_p2 = scmp.lt.s32.totalorder %s1178_s11, 3 }
   0x5   : > { %s1573_s12 = smov (%p26_p1, %s24_s12), 0  ;;  %p133_p3 = pnand %p1031_p0, %p132_p2 }
   0x6   : > { %p160_p4 = scmp.lt.s32.totalorder (!%p133_p3), %s1170_s9, 1  ;;  %s1180_s17 = smov (!%p133_p3), 126   ;;  %v1183_v14 = vmov (!%p133_p3), 0.0|0.0   ;;  %vm198_vm0 = vcmask (!%p133_p3), 1031168   ;;  %vm186_vm1 = vcmask (!%p133_p3), 1039360   ;;  %vm210_vm2 = vcmask (!%p133_p3), 1022976  }
   0x7   : > { %136 = sbr.rel (%p133_p3) target bundleno = 597 (0x255), region = 28  ;;  %s1181_s18 = smov (!%p133_p3), 127   ;;  %1090 = vmatprep.subr.bf16.mxu0 (!%p133_p3), %v1183_v14  ;;  %vm222_vm3 = vcmask (!%p133_p3), 1014784   ;;  %vm234_vm4 = vcmask (!%p133_p3), 1006592   ;;  %vm246_vm5 = vcmask (!%p133_p3), 998400   ;;  %vm258_vm6 = vcmask (!%p133_p3), 990208  }
   0x8   : > { %s1182_s19 = smov (!%p133_p3), 125   ;;  %s1184_s20 = smov (!%p133_p3), 124   ;;  %vm270_vm7 = vcmask (!%p133_p3), 982016   ;;  %vm282_vm8 = vcmask (!%p133_p3), 973824   ;;  %vm294_vm9 = vcmask (!%p133_p3), 965632   ;;  %vm306_vm10 = vcmask (!%p133_p3), 957440  }
   0x9   : > { %s1185_s21 = smov (!%p133_p3), 123   ;;  %s1186_s22 = smov (!%p133_p3), 122   ;;  %vm318_vm11 = vcmask (!%p133_p3), 949248   ;;  %vm330_vm12 = vcmask (!%p133_p3), 941056   ;;  %vm342_vm13 = vcmask (!%p133_p3), 932864   ;;  %vm354_vm14 = vcmask (!%p133_p3), 924672  }
   0xa   : > { %s1187_s23 = smov (!%p133_p3), 121   ;;  %s1188_s24 = smov (!%p133_p3), 120   ;;  %vm1196_vm15 = vmmov (!%p133_p3), 0  }
   0xb   : > { %s1189_s25 = smov (!%p133_p3), 119   ;;  %s1190_s26 = smov (!%p133_p3), 118  }
   0xc   : > { %s1191_s27 = smov (!%p133_p3), 117   ;;  %s1192_s28 = smov (!%p133_p3), 116  }
   0xd   : > { %s1193_s29 = smov (!%p133_p3), 115   ;;  %s1194_s30 = smov (!%p133_p3), 114  }
   0xe   : > { %s1575_s9 = smov (!%p160_p4, %s1170_s9), 1  ;;  %s1195_s3 = smov 113  }
   0xf   : > { %s1037_s13 = sshll.u32 %s1575_s9, 4  ;;  %s1034_s6 = sshll.u32 %s1575_s9, 3 }
  0x10   : > { %s1237_s16 = scalar_lea.vmem %s1567_s0, %s1037_s13  ;;  %s175_s13 = scalar_lea.vmem %s1569_s2, %s1034_s6 }
  0x11   : > { %v190_v0 = vld [vmem:[%s1237_s16] sm:$0x3]  ;;  %v191_v2 = vld [vmem:[%s1237_s16 + $0x8] sm:$0x3]  ;;  %v361_v6 = vld [vmem:[%s1237_s16 + $0x8] sm:$0xc] }
  0x12   : > { %v178_v1 = vld [vmem:[%s1237_s16] sm:$0x3]  ;;  %194 = vrot.lane.b32.xlu1 %v190_v0, %s1180_s17  ;;  %v179_v3 = vld [vmem:[%s1237_s16 + $0x8] sm:$0x3]  ;;  %v360_v7 = vld [vmem:[%s1237_s16] sm:$0xc] }
  0x13   : > { %182 = vrot.lane.b32.xlu0 %v178_v1, %s1181_s18  ;;  %v203_v4 = vld [vmem:[%s1237_s16 + $0x8] sm:$0x3]  ;;  %v202_v5 = vld [vmem:[%s1237_s16] sm:$0x3]  ;;  %v372_v8 = vld [vmem:[%s1237_s16 + $0x8] sm:$0xc] }
  0x14   : > { %v371_v9 = vld [vmem:[%s1237_s16] sm:$0xc]  ;;  %v383_v10 = vld [vmem:[%s1237_s16 + $0x8] sm:$0xc]  ;;  %v215_v12 = vld [vmem:[%s1237_s16 + $0x8] sm:$0x3] }
  0x15   : > { %v382_v11 = vld [vmem:[%s1237_s16] sm:$0xc]  ;;  %v214_v13 = vld [vmem:[%s1237_s16] sm:$0x3]  ;;  %v227_v15 = vld [vmem:[%s1237_s16 + $0x8] sm:$0x3] }
  0x16   : > { %196 = vrot.lane.b32.xlu1 %v191_v2, %s1180_s17  ;;  %v226_v16 = vld [vmem:[%s1237_s16] sm:$0x3]  ;;  %v358_v18 = vld [vmem:[%s1237_s16] sm:$0xc]  ;;  %v239_v19 = vld [vmem:[%s1237_s16 + $0x8] sm:$0x3] }
  0x17   : > { %184 = vrot.lane.b32.xlu0 %v179_v3, %s1181_s18  ;;  %v176_v17 = vld [vmem:[%s1237_s16] sm:$0x3]  ;;  %359 = vst [vmem:[#allocation2] sm:$0xc] %v358_v18  ;;  %v251_v21 = vld [vmem:[%s1237_s16 + $0x8] sm:$0x3] }
  0x18   : > { %177 = vst [vmem:[#allocation2] sm:$0x3] %v176_v17  ;;  %v238_v20 = vld [vmem:[%s1237_s16] sm:$0x3]  ;;  %v394_v23 = vld [vmem:[%s1237_s16 + $0x8] sm:$0xc] }
  0x19   : > { %v250_v22 = vld [vmem:[%s1237_s16] sm:$0x3]  ;;  %v393_v24 = vld [vmem:[%s1237_s16] sm:$0xc]  ;;  %v405_v25 = vld [vmem:[%s1237_s16 + $0x8] sm:$0xc] }
  0x1a   : > { %208 = vrot.lane.b32.xlu1 %v203_v4, %s1182_s19  ;;  %v404_v26 = vld [vmem:[%s1237_s16] sm:$0xc]  ;;  %v416_v27 = vld [vmem:[%s1237_s16 + $0x8] sm:$0xc]  ;;  %v263_v31 = vld [vmem:[%s1237_s16 + $0x8] sm:$0x3] }
  0x1b   : > { %206 = vrot.lane.b32.xlu0 %v202_v5, %s1182_s19  ;;  %v415_v28 = vld [vmem:[%s1237_s16] sm:$0xc]  ;;  %v427_v29 = vld [vmem:[%s1237_s16 + $0x8] sm:$0xc]  ;;  %v262_v32 = vld [vmem:[%s1237_s16] sm:$0x3] }
  0x1c   : > { %v426_v30 = vld [vmem:[%s1237_s16] sm:$0xc]  ;;  %v275_v33 = vld [vmem:[%s1237_s16 + $0x8] sm:$0x3]  ;;  %v274_v34 = vld [vmem:[%s1237_s16] sm:$0x3] }
  0x1d   : > { %v287_v35 = vld [vmem:[%s1237_s16 + $0x8] sm:$0x3]  ;;  %v286_v36 = vld [vmem:[%s1237_s16] sm:$0x3]  ;;  %v438_v39 = vld [vmem:[%s1237_s16 + $0x8] sm:$0xc] }
  0x1e   : > { %366 = vrot.lane.b32.xlu1 %v361_v6, %s1181_s18  ;;  %v299_v37 = vld [vmem:[%s1237_s16 + $0x8] sm:$0x3]  ;;  %v298_v38 = vld [vmem:[%s1237_s16] sm:$0x3]  ;;  %v437_v40 = vld [vmem:[%s1237_s16] sm:$0xc] }
  0x1f   : > { %364 = vrot.lane.b32.xlu0 %v360_v7, %s1181_s18  ;;  %v449_v41 = vld [vmem:[%s1237_s16 + $0x8] sm:$0xc]  ;;  %v448_v42 = vld [vmem:[%s1237_s16] sm:$0xc]  ;;  %v311_v47 = vld [vmem:[%s1237_s16 + $0x8] sm:$0x3] }
  0x20   : > { %v460_v43 = vld [vmem:[%s1237_s16 + $0x8] sm:$0xc]  ;;  %v459_v44 = vld [vmem:[%s1237_s16] sm:$0xc]  ;;  %v310_v48 = vld [vmem:[%s1237_s16] sm:$0x3] }
  0x21   : > { %v471_v45 = vld [vmem:[%s1237_s16 + $0x8] sm:$0xc]  ;;  %v470_v46 = vld [vmem:[%s1237_s16] sm:$0xc]  ;;  %v323_v49 = vld [vmem:[%s1237_s16 + $0x8] sm:$0x3] }
  0x22   : > { %377 = vrot.lane.b32.xlu1 %v372_v8, %s1180_s17  ;;  %v322_v50 = vld [vmem:[%s1237_s16] sm:$0x3]  ;;  %v335_v51 = vld [vmem:[%s1237_s16 + $0x8] sm:$0x3]  ;;  %v482_v55 = vld [vmem:[%s1237_s16 + $0x8] sm:$0xc] }
  0x23   : > { %375 = vrot.lane.b32.xlu0 %v371_v9, %s1180_s17  ;;  %v334_v52 = vld [vmem:[%s1237_s16] sm:$0x3]  ;;  %v347_v53 = vld [vmem:[%s1237_s16 + $0x8] sm:$0x3]  ;;  %v481_v56 = vld [vmem:[%s1237_s16] sm:$0xc] }
  0x24   : > { %v346_v54 = vld [vmem:[%s1237_s16] sm:$0x3]  ;;  %v493_v57 = vld [vmem:[%s1237_s16 + $0x8] sm:$0xc]  ;;  %v492_v58 = vld [vmem:[%s1237_s16] sm:$0xc] }
  0x25   : > { %v504_v59 = vld [vmem:[%s1237_s16 + $0x8] sm:$0xc]  ;;  %v503_v60 = vld [vmem:[%s1237_s16] sm:$0xc]  ;;  %v528_v1 = vld [vmem:[%s1237_s16 + $0x8] sm:$0x30] }
  0x26   : > { %388 = vrot.lane.b32.xlu1 %v383_v10, %s1182_s19  ;;  %v515_v61 = vld [vmem:[%s1237_s16 + $0x8] sm:$0xc]  ;;  %v514_v62 = vld [vmem:[%s1237_s16] sm:$0xc]  ;;  %v527_v2 = vld [vmem:[%s1237_s16] sm:$0x30] }
  0x27   : > { %386 = vrot.lane.b32.xlu0 %v382_v11, %s1182_s19  ;;  %v525_v7 = vld [vmem:[%s1237_s16] sm:$0x30]  ;;  %v692_v8 = vld [vmem:[%s1237_s16] sm:$0xc0]  ;;  %v539_v9 = vld [vmem:[%s1237_s16 + $0x8] sm:$0x30] }
  0x28   : > { %526 = vst [vmem:[#allocation2 + $0x3c] sm:$0x30] %v525_v7  ;;  %693 = vst [vmem:[#allocation2 + $0x3c] sm:$0xc0] %v692_v8  ;;  %v538_v10 = vld [vmem:[%s1237_s16] sm:$0x30] }
  0x2a   : > { %220 = vrot.lane.b32.xlu1 %v215_v12, %s1184_s20 }
  0x2b   : > { %218 = vrot.lane.b32.xlu0 %v214_v13, %s1184_s20 }
  0x2e   : > { %232 = vrot.lane.b32.xlu1 %v227_v15, %s1185_s21  ;;  %v550_v15 = vld [vmem:[%s1237_s16 + $0x8] sm:$0x30] }
  0x2f   : > { %230 = vrot.lane.b32.xlu0 %v226_v16, %s1185_s21  ;;  %v549_v16 = vld [vmem:[%s1237_s16] sm:$0x30] }
  0x32   : > { %244 = vrot.lane.b32.xlu1 %v239_v19, %s1186_s22 }
  0x33   : > { %242 = vrot.lane.b32.xlu0 %v238_v20, %s1186_s22  ;;  %v695_v20 = vld [vmem:[%s1237_s16 + $0x8] sm:$0xc0] }
  0x36   : > { %256 = vrot.lane.b32.xlu1 %v251_v21, %s1187_s23  ;;  %v694_v21 = vld [vmem:[%s1237_s16] sm:$0xc0] }
  0x37   : > { %254 = vrot.lane.b32.xlu0 %v250_v22, %s1187_s23 }
  0x3a   : > { %399 = vrot.lane.b32.xlu1 %v394_v23, %s1184_s20 }
  0x3b   : > { %397 = vrot.lane.b32.xlu0 %v393_v24, %s1184_s20 }
  0x3e   : > { %410 = vrot.lane.b32.xlu1 %v405_v25, %s1185_s21  ;;  %v706_v25 = vld [vmem:[%s1237_s16 + $0x8] sm:$0xc0] }
  0x3f   : > { %408 = vrot.lane.b32.xlu0 %v404_v26, %s1185_s21  ;;  %v705_v26 = vld [vmem:[%s1237_s16] sm:$0xc0] }
  0x42   : > { %421 = vrot.lane.b32.xlu1 %v416_v27, %s1186_s22 }
  0x43   : > { %419 = vrot.lane.b32.xlu0 %v415_v28, %s1186_s22 }
  0x46   : > { %432 = vrot.lane.b32.xlu1 %v427_v29, %s1187_s23 }
  0x47   : > { %430 = vrot.lane.b32.xlu0 %v426_v30, %s1187_s23  ;;  %v717_v30 = vld [vmem:[%s1237_s16 + $0x8] sm:$0xc0] }
  0x4a   : > { %268 = vrot.lane.b32.xlu1 %v263_v31, %s1188_s24  ;;  %v716_v31 = vld [vmem:[%s1237_s16] sm:$0xc0] }
  0x4b   : > { %266 = vrot.lane.b32.xlu0 %v262_v32, %s1188_s24 }
  0x4e   : > { %280 = vrot.lane.b32.xlu1 %v275_v33, %s1189_s25 }
  0x4f   : > { %278 = vrot.lane.b32.xlu0 %v274_v34, %s1189_s25 }
  0x52   : > { %292 = vrot.lane.b32.xlu1 %v287_v35, %s1190_s26  ;;  %v561_v35 = vld [vmem:[%s1237_s16 + $0x8] sm:$0x30] }
  0x53   : > { %290 = vrot.lane.b32.xlu0 %v286_v36, %s1190_s26  ;;  %v560_v36 = vld [vmem:[%s1237_s16] sm:$0x30] }
  0x56   : > { %304 = vrot.lane.b32.xlu1 %v299_v37, %s1191_s27 }
  0x57   : > { %302 = vrot.lane.b32.xlu0 %v298_v38, %s1191_s27 }
  0x5a   : > { %443 = vrot.lane.b32.xlu1 %v438_v39, %s1188_s24 }
  0x5b   : > { %441 = vrot.lane.b32.xlu0 %v437_v40, %s1188_s24 }
  0x5e   : > { %454 = vrot.lane.b32.xlu1 %v449_v41, %s1189_s25 }
  0x5f   : > { %452 = vrot.lane.b32.xlu0 %v448_v42, %s1189_s25 }
  0x62   : > { %465 = vrot.lane.b32.xlu1 %v460_v43, %s1190_s26  ;;  %v572_v43 = vld [vmem:[%s1237_s16 + $0x8] sm:$0x30] }
  0x63   : > { %463 = vrot.lane.b32.xlu0 %v459_v44, %s1190_s26  ;;  %v571_v44 = vld [vmem:[%s1237_s16] sm:$0x30] }
  0x66   : > { %476 = vrot.lane.b32.xlu1 %v471_v45, %s1191_s27 }
  0x67   : > { %474 = vrot.lane.b32.xlu0 %v470_v46, %s1191_s27 }
  0x6a   : > { %316 = vrot.lane.b32.xlu1 %v311_v47, %s1192_s28 }
  0x6b   : > { %314 = vrot.lane.b32.xlu0 %v310_v48, %s1192_s28  ;;  %v583_v48 = vld [vmem:[%s1237_s16 + $0x8] sm:$0x30] }
  0x6e   : > { %328 = vrot.lane.b32.xlu1 %v323_v49, %s1193_s29  ;;  %v582_v49 = vld [vmem:[%s1237_s16] sm:$0x30] }
  0x6f   : > { %326 = vrot.lane.b32.xlu0 %v322_v50, %s1193_s29 }
  0x72   : > { %340 = vrot.lane.b32.xlu1 %v335_v51, %s1194_s30 }
  0x73   : > { %338 = vrot.lane.b32.xlu0 %v334_v52, %s1194_s30 }
  0x76   : > { %352 = vrot.lane.b32.xlu1 %v347_v53, %s1195_s3  ;;  %v594_v53 = vld [vmem:[%s1237_s16 + $0x8] sm:$0x30] }
  0x77   : > { %350 = vrot.lane.b32.xlu0 %v346_v54, %s1195_s3  ;;  %v593_v54 = vld [vmem:[%s1237_s16] sm:$0x30] }
  0x7a   : > { %487 = vrot.lane.b32.xlu1 %v482_v55, %s1192_s28 }
  0x7b   : > { %485 = vrot.lane.b32.xlu0 %v481_v56, %s1192_s28 }
  0x7e   : > { %498 = vrot.lane.b32.xlu1 %v493_v57, %s1193_s29 }
  0x7f   : > { %496 = vrot.lane.b32.xlu0 %v492_v58, %s1193_s29  ;;  %v728_v58 = vld [vmem:[%s1237_s16 + $0x8] sm:$0xc0] }
  0x82   : > { %509 = vrot.lane.b32.xlu1 %v504_v59, %s1194_s30  ;;  %v727_v59 = vld [vmem:[%s1237_s16] sm:$0xc0] }
  0x83   : > { %507 = vrot.lane.b32.xlu0 %v503_v60, %s1194_s30 }
  0x84   : > { %v195_v63 = vpop.permute.xlu1 %194 }
  0x85   : > { %v183_v0 = vpop.permute.xlu0 %182 }
  0x86   : > { %520 = vrot.lane.b32.xlu1 %v515_v61, %s1195_s3 }
  0x87   : > { %518 = vrot.lane.b32.xlu0 %v514_v62, %s1195_s3 }
  0x88   : > { %v197_v3 = vpop.permute.xlu1 %196 }
  0x89   : > { %v185_v4 = vpop.permute.xlu0 %184  ;;  %v199_v5 = vsel %vm198_vm0, %v195_v63, %v197_v3  ;;  %v739_v63 = vld [vmem:[%s1237_s16 + $0x8] sm:$0xc0] }
  0x8a   : > { %v187_v6 = vsel %vm186_vm1, %v183_v0, %v185_v4  ;;  %201 = vst [vmem:[#allocation2 + $0x8] sm:$0x3] %v199_v5  ;;  %533 = vrot.lane.b32.xlu1 %v528_v1, %s1181_s18  ;;  %v738_v0 = vld [vmem:[%s1237_s16] sm:$0xc0]  ;;  %v750_v4 = vld [vmem:[%s1237_s16 + $0x8] sm:$0xc0] }
  0x8b   : > { %189 = vst [vmem:[#allocation2 + $0x4] sm:$0x3] %v187_v6  ;;  %531 = vrot.lane.b32.xlu0 %v527_v2, %s1181_s18  ;;  %v749_v5 = vld [vmem:[%s1237_s16] sm:$0xc0] }
  0x8c   : > { %v209_v11 = vpop.permute.xlu1 %208 }
  0x8d   : > { %v207_v12 = vpop.permute.xlu0 %206 }
  0x8e   : > { %v211_v13 = vsel %vm210_vm2, %v207_v12, %v209_v11  ;;  %544 = vrot.lane.b32.xlu1 %v539_v9, %s1180_s17  ;;  %v761_v9 = vld [vmem:[%s1237_s16 + $0x8] sm:$0xc0] }
  0x8f   : > { %213 = vst [vmem:[#allocation2 + $0xc] sm:$0x3] %v211_v13  ;;  %542 = vrot.lane.b32.xlu0 %v538_v10, %s1180_s17  ;;  %v760_v10 = vld [vmem:[%s1237_s16] sm:$0xc0] }
  0x90   : > { %v367_v17 = vpop.permute.xlu1 %366 }
  0x91   : > { %v365_v18 = vpop.permute.xlu0 %364 }
  0x92   : > { %v368_v19 = vsel %vm186_vm1, %v365_v18, %v367_v17  ;;  %555 = vrot.lane.b32.xlu1 %v550_v15, %s1182_s19  ;;  %v605_v15 = vld [vmem:[%s1237_s16 + $0x8] sm:$0x30] }
  0x93   : > { %370 = vst [vmem:[#allocation2 + $0x4] sm:$0xc] %v368_v19  ;;  %553 = vrot.lane.b32.xlu0 %v549_v16, %s1182_s19  ;;  %v604_v16 = vld [vmem:[%s1237_s16] sm:$0x30] }
  0x94   : > { %v378_v22 = vpop.permute.xlu1 %377 }
  0x95   : > { %v376_v23 = vpop.permute.xlu0 %375 }
  0x96   : > { %v379_v24 = vsel %vm198_vm0, %v376_v23, %v378_v22  ;;  %700 = vrot.lane.b32.xlu1 %v695_v20, %s1181_s18  ;;  %v616_v23 = vld [vmem:[%s1237_s16 + $0x8] sm:$0x30] }
  0x97   : > { %381 = vst [vmem:[#allocation2 + $0x8] sm:$0xc] %v379_v24  ;;  %698 = vrot.lane.b32.xlu0 %v694_v21, %s1181_s18  ;;  %v615_v24 = vld [vmem:[%s1237_s16] sm:$0x30] }
  0x98   : > { %v389_v27 = vpop.permute.xlu1 %388 }
  0x99   : > { %v387_v28 = vpop.permute.xlu0 %386 }
  0x9a   : > { %v390_v29 = vsel %vm210_vm2, %v387_v28, %v389_v27  ;;  %711 = vrot.lane.b32.xlu1 %v706_v25, %s1180_s17  ;;  %v860_v40 = vld [vmem:[#allocation2] sm:$0xff]  ;;  %v627_v28 = vld [vmem:[%s1237_s16 + $0x8] sm:$0x30] }
  0x9b   : > { %392 = vst [vmem:[#allocation2 + $0xc] sm:$0xc] %v390_v29  ;;  %709 = vrot.lane.b32.xlu0 %v705_v26, %s1180_s17  ;;  %v626_v29 = vld [vmem:[%s1237_s16] sm:$0x30] }
  0x9c   : > { %v221_v32 = vpop.permute.xlu1 %220 }
  0x9d   : > { %v219_v33 = vpop.permute.xlu0 %218 }
  0x9e   : > { %v223_v34 = vsel %vm222_vm3, %v219_v33, %v221_v32  ;;  %722 = vrot.lane.b32.xlu1 %v717_v30, %s1182_s19  ;;  %v638_v33 = vld [vmem:[%s1237_s16 + $0x8] sm:$0x30] }
  0x9f   : > { %225 = vst [vmem:[#allocation2 + $0x10] sm:$0x3] %v223_v34  ;;  %720 = vrot.lane.b32.xlu0 %v716_v31, %s1182_s19  ;;  %v637_v34 = vld [vmem:[%s1237_s16] sm:$0x30] }
  0xa0   : > { %v233_v37 = vpop.permute.xlu1 %232 }
  0xa1   : > { %v231_v38 = vpop.permute.xlu0 %230 }
  0xa2   : > { %v235_v39 = vsel %vm234_vm4, %v231_v38, %v233_v37  ;;  %v861_v41 = vld [vmem:[#allocation2 + $0x8] sm:$0xff]  ;;  %566 = vrot.lane.b32.xlu1 %v561_v35, %s1184_s20 }
  0xa3   : > { %237 = vst [vmem:[#allocation2 + $0x14] sm:$0x3] %v235_v39  ;;  %564 = vrot.lane.b32.xlu0 %v560_v36, %s1184_s20  ;;  %v1091_v42 = vpack.c.bf16 %v861_v41, %v860_v40  ;;  %v772_v38 = vld [vmem:[%s1237_s16 + $0x8] sm:$0xc0]  ;;  %v771_v39 = vld [vmem:[%s1237_s16] sm:$0xc0] }
  0xa4   : > { %v245_v45 = vpop.permute.xlu1 %244 }
  0xa5   : > { %v243_v46 = vpop.permute.xlu0 %242  ;;  %1092 = vmatpush3.bf16.msra.mxu0 %v1091_v42 }
  0xa6   : > { %v247_v47 = vsel %vm246_vm5, %v243_v46, %v245_v45  ;;  %1093 = vmatprep.subr.bf16.mxu0 %v1183_v14  ;;  %577 = vrot.lane.b32.xlu1 %v572_v43, %s1185_s21  ;;  %v783_v43 = vld [vmem:[%s1237_s16 + $0x8] sm:$0xc0] }
  0xa7   : > { %249 = vst [vmem:[#allocation2 + $0x18] sm:$0x3] %v247_v47  ;;  %575 = vrot.lane.b32.xlu0 %v571_v44, %s1185_s21  ;;  %v782_v44 = vld [vmem:[%s1237_s16] sm:$0xc0] }
  0xa8   : > { %v257_v50 = vpop.permute.xlu1 %256 }
  0xa9   : > { %v255_v51 = vpop.permute.xlu0 %254 }
  0xaa   : > { %v259_v52 = vsel %vm258_vm6, %v255_v51, %v257_v50  ;;  %588 = vrot.lane.b32.xlu1 %v583_v48, %s1186_s22  ;;  %v794_v48 = vld [vmem:[%s1237_s16 + $0x8] sm:$0xc0] }
  0xab   : > { %261 = vst [vmem:[#allocation2 + $0x1c] sm:$0x3] %v259_v52  ;;  %586 = vrot.lane.b32.xlu0 %v582_v49, %s1186_s22  ;;  %v793_v49 = vld [vmem:[%s1237_s16] sm:$0xc0] }
  0xac   : > { %v400_v55 = vpop.permute.xlu1 %399 }
  0xad   : > { %v398_v56 = vpop.permute.xlu0 %397 }
  0xae   : > { %v401_v57 = vsel %vm222_vm3, %v398_v56, %v400_v55  ;;  %599 = vrot.lane.b32.xlu1 %v594_v53, %s1187_s23  ;;  %v805_v53 = vld [vmem:[%s1237_s16 + $0x8] sm:$0xc0] }
  0xaf   : > { %403 = vst [vmem:[#allocation2 + $0x10] sm:$0xc] %v401_v57  ;;  %597 = vrot.lane.b32.xlu0 %v593_v54, %s1187_s23  ;;  %v804_v54 = vld [vmem:[%s1237_s16] sm:$0xc0] }
  0xb0   : > { %v411_v60 = vpop.permute.xlu1 %410 }
  0xb1   : > { %v409_v61 = vpop.permute.xlu0 %408 }
  0xb2   : > { %v412_v62 = vsel %vm234_vm4, %v409_v61, %v411_v60  ;;  %733 = vrot.lane.b32.xlu1 %v728_v58, %s1184_s20  ;;  %v649_v58 = vld [vmem:[%s1237_s16 + $0x8] sm:$0x30] }
  0xb3   : > { %414 = vst [vmem:[#allocation2 + $0x14] sm:$0xc] %v412_v62  ;;  %731 = vrot.lane.b32.xlu0 %v727_v59, %s1184_s20  ;;  %v648_v59 = vld [vmem:[%s1237_s16] sm:$0x30] }
  0xb4   : > { %v422_v1 = vpop.permute.xlu1 %421 }
  0xb5   : > { %v420_v2 = vpop.permute.xlu0 %419 }
  0xb6   : > { %v423_v3 = vsel %vm246_vm5, %v420_v2, %v422_v1  ;;  %744 = vrot.lane.b32.xlu1 %v739_v63, %s1185_s21  ;;  %v660_v2 = vld [vmem:[%s1237_s16 + $0x8] sm:$0x30] }
  0xb7   : > { %425 = vst [vmem:[#allocation2 + $0x18] sm:$0xc] %v423_v3  ;;  %742 = vrot.lane.b32.xlu0 %v738_v0, %s1185_s21  ;;  %v659_v3 = vld [vmem:[%s1237_s16] sm:$0x30] }
  0xb8   : > { %v433_v6 = vpop.permute.xlu1 %432 }
  0xb9   : > { %v431_v7 = vpop.permute.xlu0 %430 }
  0xba   : > { %v434_v8 = vsel %vm258_vm6, %v431_v7, %v433_v6  ;;  %755 = vrot.lane.b32.xlu1 %v750_v4, %s1186_s22  ;;  %v862_v20 = vld [vmem:[#allocation2 + $0x10] sm:$0xff]  ;;  %v671_v7 = vld [vmem:[%s1237_s16 + $0x8] sm:$0x30] }
  0xbb   : > { %436 = vst [vmem:[#allocation2 + $0x1c] sm:$0xc] %v434_v8  ;;  %753 = vrot.lane.b32.xlu0 %v749_v5, %s1186_s22  ;;  %v670_v8 = vld [vmem:[%s1237_s16] sm:$0x30] }
  0xbc   : > { %v269_v11 = vpop.permute.xlu1 %268 }
  0xbd   : > { %v267_v12 = vpop.permute.xlu0 %266 }
  0xbe   : > { %v271_v13 = vsel %vm270_vm7, %v267_v12, %v269_v11  ;;  %766 = vrot.lane.b32.xlu1 %v761_v9, %s1187_s23  ;;  %v682_v12 = vld [vmem:[%s1237_s16 + $0x8] sm:$0x30] }
  0xbf   : > { %273 = vst [vmem:[#allocation2 + $0x20] sm:$0x3] %v271_v13  ;;  %764 = vrot.lane.b32.xlu0 %v760_v10, %s1187_s23  ;;  %v681_v13 = vld [vmem:[%s1237_s16] sm:$0x30] }
  0xc0   : > { %v281_v17 = vpop.permute.xlu1 %280 }
  0xc1   : > { %v279_v18 = vpop.permute.xlu0 %278 }
  0xc2   : > { %v283_v19 = vsel %vm282_vm8, %v279_v18, %v281_v17  ;;  %v863_v21 = vld [vmem:[#allocation2 + $0x18] sm:$0xff]  ;;  %610 = vrot.lane.b32.xlu1 %v605_v15, %s1188_s24  ;;  %v816_v18 = vld [vmem:[%s1237_s16 + $0x8] sm:$0xc0] }
  0xc3   : > { %285 = vst [vmem:[#allocation2 + $0x24] sm:$0x3] %v283_v19  ;;  %608 = vrot.lane.b32.xlu0 %v604_v16, %s1188_s24  ;;  %v1094_v22 = vpack.c.bf16 %v863_v21, %v862_v20  ;;  %v815_v19 = vld [vmem:[%s1237_s16] sm:$0xc0] }
  0xc4   : > { %v293_v25 = vpop.permute.xlu1 %292 }
  0xc5   : > { %v291_v26 = vpop.permute.xlu0 %290  ;;  %1095 = vmatpush3.bf16.msra.mxu0 %v1094_v22 }
  0xc6   : > { %v295_v27 = vsel %vm294_vm9, %v291_v26, %v293_v25  ;;  %1096 = vmatprep.subr.bf16.mxu0 %v1183_v14  ;;  %621 = vrot.lane.b32.xlu1 %v616_v23, %s1189_s25  ;;  %v827_v23 = vld [vmem:[%s1237_s16 + $0x8] sm:$0xc0] }
  0xc7   : > { %297 = vst [vmem:[#allocation2 + $0x28] sm:$0x3] %v295_v27  ;;  %619 = vrot.lane.b32.xlu0 %v615_v24, %s1189_s25  ;;  %v826_v24 = vld [vmem:[%s1237_s16] sm:$0xc0] }
  0xc8   : > { %v305_v30 = vpop.permute.xlu1 %304 }
  0xc9   : > { %v303_v31 = vpop.permute.xlu0 %302 }
  0xca   : > { %v307_v32 = vsel %vm306_vm10, %v303_v31, %v305_v30  ;;  %632 = vrot.lane.b32.xlu1 %v627_v28, %s1190_s26  ;;  %v838_v28 = vld [vmem:[%s1237_s16 + $0x8] sm:$0xc0] }
  0xcb   : > { %309 = vst [vmem:[#allocation2 + $0x2c] sm:$0x3] %v307_v32  ;;  %630 = vrot.lane.b32.xlu0 %v626_v29, %s1190_s26  ;;  %v837_v29 = vld [vmem:[%s1237_s16] sm:$0xc0] }
  0xcc   : > { %v444_v35 = vpop.permute.xlu1 %443 }
  0xcd   : > { %v442_v36 = vpop.permute.xlu0 %441 }
  0xce   : > { %v445_v37 = vsel %vm270_vm7, %v442_v36, %v444_v35  ;;  %643 = vrot.lane.b32.xlu1 %v638_v33, %s1191_s27  ;;  %v849_v33 = vld [vmem:[%s1237_s16 + $0x8] sm:$0xc0] }
  0xcf   : > { %447 = vst [vmem:[#allocation2 + $0x20] sm:$0xc] %v445_v37  ;;  %641 = vrot.lane.b32.xlu0 %v637_v34, %s1191_s27  ;;  %v848_v34 = vld [vmem:[%s1237_s16] sm:$0xc0] }
  0xd0   : > { %v455_v40 = vpop.permute.xlu1 %454 }
  0xd1   : > { %v453_v41 = vpop.permute.xlu0 %452 }
  0xd2   : > { %v456_v42 = vsel %vm282_vm8, %v453_v41, %v455_v40  ;;  %777 = vrot.lane.b32.xlu1 %v772_v38, %s1188_s24  ;;  %v1197_v38 = vmov 0.0  }
  0xd3   : > { %458 = vst [vmem:[#allocation2 + $0x24] sm:$0xc] %v456_v42  ;;  %775 = vrot.lane.b32.xlu0 %v771_v39, %s1188_s24  ;;  %1087 = vmatprep.mubr.msk.f32.mxu0 %vm1196_vm15, %v1197_v38 }
  0xd4   : > { %v466_v45 = vpop.permute.xlu1 %465 }
  0xd5   : > { %v464_v46 = vpop.permute.xlu0 %463 }
  0xd6   : > { %v467_v47 = vsel %vm294_vm9, %v464_v46, %v466_v45  ;;  %788 = vrot.lane.b32.xlu1 %v783_v43, %s1189_s25 }
  0xd7   : > { %469 = vst [vmem:[#allocation2 + $0x28] sm:$0xc] %v467_v47  ;;  %786 = vrot.lane.b32.xlu0 %v782_v44, %s1189_s25 }
  0xd8   : > { %v477_v50 = vpop.permute.xlu1 %476 }
  0xd9   : > { %v475_v51 = vpop.permute.xlu0 %474 }
  0xda   : > { %v478_v52 = vsel %vm306_vm10, %v475_v51, %v477_v50  ;;  %799 = vrot.lane.b32.xlu1 %v794_v48, %s1190_s26  ;;  %v864_v63 = vld [vmem:[#allocation2 + $0x20] sm:$0xff] }
  0xdb   : > { %480 = vst [vmem:[#allocation2 + $0x2c] sm:$0xc] %v478_v52  ;;  %797 = vrot.lane.b32.xlu0 %v793_v49, %s1190_s26 }
  0xdc   : > { %v317_v55 = vpop.permute.xlu1 %316 }
  0xdd   : > { %v315_v56 = vpop.permute.xlu0 %314 }
  0xde   : > { %v319_v57 = vsel %vm318_vm11, %v315_v56, %v317_v55  ;;  %810 = vrot.lane.b32.xlu1 %v805_v53, %s1191_s27 }
  0xdf   : > { %321 = vst [vmem:[#allocation2 + $0x30] sm:$0x3] %v319_v57  ;;  %808 = vrot.lane.b32.xlu0 %v804_v54, %s1191_s27 }
  0xe0   : > { %v329_v60 = vpop.permute.xlu1 %328 }
  0xe1   : > { %v327_v61 = vpop.permute.xlu0 %326 }
  0xe2   : > { %v331_v62 = vsel %vm330_vm12, %v327_v61, %v329_v60  ;;  %v865_v0 = vld [vmem:[#allocation2 + $0x28] sm:$0xff]  ;;  %654 = vrot.lane.b32.xlu1 %v649_v58, %s1192_s28 }
  0xe3   : > { %333 = vst [vmem:[#allocation2 + $0x34] sm:$0x3] %v331_v62  ;;  %652 = vrot.lane.b32.xlu0 %v648_v59, %s1192_s28  ;;  %v1097_v1 = vpack.c.bf16 %v865_v0, %v864_v63 }
  0xe4   : > { %v341_v4 = vpop.permute.xlu1 %340 }
  0xe5   : > { %v339_v5 = vpop.permute.xlu0 %338  ;;  %1098 = vmatpush3.bf16.msra.mxu0 %v1097_v1 }
  0xe6   : > { %v343_v6 = vsel %vm342_vm13, %v339_v5, %v341_v4  ;;  %1099 = vmatprep.subr.bf16.mxu0 %v1183_v14  ;;  %665 = vrot.lane.b32.xlu1 %v660_v2, %s1193_s29 }
  0xe7   : > { %345 = vst [vmem:[#allocation2 + $0x38] sm:$0x3] %v343_v6  ;;  %663 = vrot.lane.b32.xlu0 %v659_v3, %s1193_s29 }
  0xe8   : > { %v353_v9 = vpop.permute.xlu1 %352 }
  0xe9   : > { %v351_v10 = vpop.permute.xlu0 %350 }
  0xea   : > { %v355_v11 = vsel %vm354_vm14, %v351_v10, %v353_v9  ;;  %676 = vrot.lane.b32.xlu1 %v671_v7, %s1194_s30 }
  0xeb   : > { %357 = vst [vmem:[#allocation2 + $0x3c] sm:$0x3] %v355_v11  ;;  %674 = vrot.lane.b32.xlu0 %v670_v8, %s1194_s30 }
  0xec   : > { %v488_v15 = vpop.permute.xlu1 %487 }
  0xed   : > { %v486_v16 = vpop.permute.xlu0 %485 }
  0xee   : > { %v489_v17 = vsel %vm318_vm11, %v486_v16, %v488_v15  ;;  %687 = vrot.lane.b32.xlu1 %v682_v12, %s1195_s3 }
  0xef   : > { %491 = vst [vmem:[#allocation2 + $0x30] sm:$0xc] %v489_v17  ;;  %685 = vrot.lane.b32.xlu0 %v681_v13, %s1195_s3 }
  0xf0   : > { %v499_v20 = vpop.permute.xlu1 %498 }
  0xf1   : > { %v497_v21 = vpop.permute.xlu0 %496 }
  0xf2   : > { %v500_v22 = vsel %vm330_vm12, %v497_v21, %v499_v20  ;;  %821 = vrot.lane.b32.xlu1 %v816_v18, %s1192_s28 }
  0xf3   : > { %502 = vst [vmem:[#allocation2 + $0x34] sm:$0xc] %v500_v22  ;;  %819 = vrot.lane.b32.xlu0 %v815_v19, %s1192_s28 }
  0xf4   : > { %v510_v25 = vpop.permute.xlu1 %509 }
  0xf5   : > { %v508_v26 = vpop.permute.xlu0 %507 }
  0xf6   : > { %v511_v27 = vsel %vm342_vm13, %v508_v26, %v510_v25  ;;  %832 = vrot.lane.b32.xlu1 %v827_v23, %s1193_s29 }
  0xf7   : > { %513 = vst [vmem:[#allocation2 + $0x38] sm:$0xc] %v511_v27  ;;  %830 = vrot.lane.b32.xlu0 %v826_v24, %s1193_s29 }
  0xf8   : > { %v521_v30 = vpop.permute.xlu1 %520 }
  0xf9   : > { %v519_v31 = vpop.permute.xlu0 %518 }
  0xfa   : > { %v522_v32 = vsel %vm354_vm14, %v519_v31, %v521_v30  ;;  %843 = vrot.lane.b32.xlu1 %v838_v28, %s1194_s30  ;;  %v866_v42 = vld [vmem:[#allocation2 + $0x30] sm:$0xff] }
  0xfb   : > { %524 = vst [vmem:[#allocation2 + $0x3c] sm:$0xc] %v522_v32  ;;  %841 = vrot.lane.b32.xlu0 %v837_v29, %s1194_s30 }
  0xfc   : > { %v534_v35 = vpop.permute.xlu1 %533 }
  0xfd   : > { %v532_v36 = vpop.permute.xlu0 %531 }
  0xfe   : > { %v535_v37 = vsel %vm186_vm1, %v532_v36, %v534_v35  ;;  %854 = vrot.lane.b32.xlu1 %v849_v33, %s1195_s3 }
  0xff   : > { %537 = vst [vmem:[#allocation2 + $0x40] sm:$0x30] %v535_v37  ;;  %852 = vrot.lane.b32.xlu0 %v848_v34, %s1195_s3 }
 0x100   : > { %v545_v39 = vpop.permute.xlu1 %544 }
 0x101   : > { %v543_v40 = vpop.permute.xlu0 %542 }
 0x102   : > { %v546_v41 = vsel %vm198_vm0, %v543_v40, %v545_v39  ;;  %v867_v43 = vld [vmem:[#allocation2 + $0x38] sm:$0xff] }
 0x103   : > { %548 = vst [vmem:[#allocation2 + $0x44] sm:$0x30] %v546_v41  ;;  %v1100_v44 = vpack.c.bf16 %v867_v43, %v866_v42 }
 0x104   : > { %v556_v45 = vpop.permute.xlu1 %555 }
 0x105   : > { %v554_v46 = vpop.permute.xlu0 %553  ;;  %1101 = vmatpush3.bf16.msra.mxu0 %v1100_v44 }
 0x106   : > { %v557_v47 = vsel %vm210_vm2, %v554_v46, %v556_v45  ;;  %1102 = vmatprep.subr.bf16.mxu0 %v1183_v14 }
 0x107   : > { %559 = vst [vmem:[#allocation2 + $0x48] sm:$0x30] %v557_v47 }
 0x108   : > { %v701_v48 = vpop.permute.xlu1 %700 }
 0x109   : > { %v699_v49 = vpop.permute.xlu0 %698 }
 0x10a   : > { %v702_v50 = vsel %vm186_vm1, %v699_v49, %v701_v48 }
 0x10b   : > { %704 = vst [vmem:[#allocation2 + $0x40] sm:$0xc0] %v702_v50 }
 0x10c   : > { %v712_v51 = vpop.permute.xlu1 %711 }
 0x10d   : > { %v710_v52 = vpop.permute.xlu0 %709 }
 0x10e   : > { %v713_v53 = vsel %vm198_vm0, %v710_v52, %v712_v51 }
 0x10f   : > { %715 = vst [vmem:[#allocation2 + $0x44] sm:$0xc0] %v713_v53 }
 0x110   : > { %v723_v54 = vpop.permute.xlu1 %722 }
 0x111   : > { %v721_v55 = vpop.permute.xlu0 %720 }
 0x112   : > { %v724_v56 = vsel %vm210_vm2, %v721_v55, %v723_v54  ;;  %v868_v63 = vld [vmem:[#allocation2 + $0x40] sm:$0xff] }
 0x113   : > { %726 = vst [vmem:[#allocation2 + $0x48] sm:$0xc0] %v724_v56 }
 0x114   : > { %v567_v57 = vpop.permute.xlu1 %566 }
 0x115   : > { %v565_v58 = vpop.permute.xlu0 %564 }
 0x116   : > { %v568_v59 = vsel %vm222_vm3, %v565_v58, %v567_v57 }
 0x117   : > { %570 = vst [vmem:[#allocation2 + $0x4c] sm:$0x30] %v568_v59 }
 0x118   : > { %v578_v60 = vpop.permute.xlu1 %577 }
 0x119   : > { %v576_v61 = vpop.permute.xlu0 %575 }
 0x11a   : > { %v579_v62 = vsel %vm234_vm4, %v576_v61, %v578_v60  ;;  %v869_v0 = vld [vmem:[#allocation2 + $0x48] sm:$0xff] }
 0x11b   : > { %581 = vst [vmem:[#allocation2 + $0x50] sm:$0x30] %v579_v62  ;;  %v1103_v1 = vpack.c.bf16 %v869_v0, %v868_v63 }
 0x11c   : > { %v589_v2 = vpop.permute.xlu1 %588 }
 0x11d   : > { %v587_v3 = vpop.permute.xlu0 %586  ;;  %1104 = vmatpush3.bf16.msra.mxu0 %v1103_v1 }
 0x11e   : > { %v590_v4 = vsel %vm246_vm5, %v587_v3, %v589_v2  ;;  %1105 = vmatprep.subr.bf16.mxu0 %v1183_v14 }
 0x11f   : > { %592 = vst [vmem:[#allocation2 + $0x54] sm:$0x30] %v590_v4 }
 0x120   : > { %v600_v5 = vpop.permute.xlu1 %599 }
 0x121   : > { %v598_v6 = vpop.permute.xlu0 %597 }
 0x122   : > { %v601_v7 = vsel %vm258_vm6, %v598_v6, %v600_v5 }
 0x123   : > { %603 = vst [vmem:[#allocation2 + $0x58] sm:$0x30] %v601_v7 }
 0x124   : > { %v734_v8 = vpop.permute.xlu1 %733 }
 0x125   : > { %v732_v9 = vpop.permute.xlu0 %731 }
 0x126   : > { %v735_v10 = vsel %vm222_vm3, %v732_v9, %v734_v8 }
 0x127   : > { %737 = vst [vmem:[#allocation2 + $0x4c] sm:$0xc0] %v735_v10 }
 0x128   : > { %v745_v11 = vpop.permute.xlu1 %744 }
 0x129   : > { %v743_v12 = vpop.permute.xlu0 %742 }
 0x12a   : > { %v746_v13 = vsel %vm234_vm4, %v743_v12, %v745_v11 }
 0x12b   : > { %748 = vst [vmem:[#allocation2 + $0x50] sm:$0xc0] %v746_v13  ;;  %v859_v13 = vld [vmem:[%s1568_s1] sm:$0xff] }
 0x12c   : > { %v756_v15 = vpop.permute.xlu1 %755 }
 0x12d   : > { %v754_v16 = vpop.permute.xlu0 %753 }
 0x12e   : > { %v757_v17 = vsel %vm246_vm5, %v754_v16, %v756_v15 }
 0x12f   : > { %759 = vst [vmem:[#allocation2 + $0x54] sm:$0xc0] %v757_v17 }
 0x130   : > { %v767_v18 = vpop.permute.xlu1 %766 }
 0x131   : > { %v765_v19 = vpop.permute.xlu0 %764 }
 0x132   : > { %v768_v20 = vsel %vm258_vm6, %v765_v19, %v767_v18  ;;  %v870_v27 = vld [vmem:[#allocation2 + $0x50] sm:$0xff] }
 0x133   : > { %770 = vst [vmem:[#allocation2 + $0x58] sm:$0xc0] %v768_v20 }
 0x134   : > { %v611_v21 = vpop.permute.xlu1 %610 }
 0x135   : > { %v609_v22 = vpop.permute.xlu0 %608 }
 0x136   : > { %v612_v23 = vsel %vm270_vm7, %v609_v22, %v611_v21 }
 0x137   : > { %614 = vst [vmem:[#allocation2 + $0x5c] sm:$0x30] %v612_v23 }
 0x138   : > { %v622_v24 = vpop.permute.xlu1 %621 }
 0x139   : > { %v620_v25 = vpop.permute.xlu0 %619 }
 0x13a   : > { %v623_v26 = vsel %vm282_vm8, %v620_v25, %v622_v24  ;;  %v871_v28 = vld [vmem:[#allocation2 + $0x58] sm:$0xff] }
 0x13b   : > { %625 = vst [vmem:[#allocation2 + $0x60] sm:$0x30] %v623_v26  ;;  %v1106_v29 = vpack.c.bf16 %v871_v28, %v870_v27 }
 0x13c   : > { %v633_v30 = vpop.permute.xlu1 %632 }
 0x13d   : > { %v631_v31 = vpop.permute.xlu0 %630  ;;  %1107 = vmatpush3.bf16.msra.mxu0 %v1106_v29 }
 0x13e   : > { %v634_v32 = vsel %vm294_vm9, %v631_v31, %v633_v30  ;;  %1108 = vmatprep.subr.bf16.mxu0 %v1183_v14 }
 0x13f   : > { %636 = vst [vmem:[#allocation2 + $0x64] sm:$0x30] %v634_v32 }
 0x140   : > { %v644_v33 = vpop.permute.xlu1 %643 }
 0x141   : > { %v642_v34 = vpop.permute.xlu0 %641 }
 0x142   : > { %v645_v35 = vsel %vm306_vm10, %v642_v34, %v644_v33 }
 0x143   : > { %647 = vst [vmem:[#allocation2 + $0x68] sm:$0x30] %v645_v35 }
 0x144   : > { %v778_v36 = vpop.permute.xlu1 %777 }
 0x145   : > { %v776_v37 = vpop.permute.xlu0 %775 }
 0x146   : > { %v779_v38 = vsel %vm270_vm7, %v776_v37, %v778_v36 }
 0x147   : > { %781 = vst [vmem:[#allocation2 + $0x5c] sm:$0xc0] %v779_v38 }
 0x148   : > { %v789_v39 = vpop.permute.xlu1 %788 }
 0x149   : > { %v787_v40 = vpop.permute.xlu0 %786 }
 0x14a   : > { %v790_v41 = vsel %vm282_vm8, %v787_v40, %v789_v39 }
 0x14b   : > { %792 = vst [vmem:[#allocation2 + $0x60] sm:$0xc0] %v790_v41 }
 0x14c   : > { %v800_v42 = vpop.permute.xlu1 %799 }
 0x14d   : > { %v798_v43 = vpop.permute.xlu0 %797 }
 0x14e   : > { %v801_v44 = vsel %vm294_vm9, %v798_v43, %v800_v42 }
 0x14f   : > { %803 = vst [vmem:[#allocation2 + $0x64] sm:$0xc0] %v801_v44 }
 0x150   : > { %v811_v45 = vpop.permute.xlu1 %810 }
 0x151   : > { %v809_v46 = vpop.permute.xlu0 %808 }
 0x152   : > { %v812_v47 = vsel %vm306_vm10, %v809_v46, %v811_v45  ;;  %v872_v54 = vld [vmem:[#allocation2 + $0x60] sm:$0xff] }
 0x153   : > { %814 = vst [vmem:[#allocation2 + $0x68] sm:$0xc0] %v812_v47 }
 0x154   : > { %v655_v48 = vpop.permute.xlu1 %654 }
 0x155   : > { %v653_v49 = vpop.permute.xlu0 %652 }
 0x156   : > { %v656_v50 = vsel %vm318_vm11, %v653_v49, %v655_v48 }
 0x157   : > { %658 = vst [vmem:[#allocation2 + $0x6c] sm:$0x30] %v656_v50 }
 0x158   : > { %v666_v51 = vpop.permute.xlu1 %665 }
 0x159   : > { %v664_v52 = vpop.permute.xlu0 %663 }
 0x15a   : > { %v667_v53 = vsel %vm330_vm12, %v664_v52, %v666_v51  ;;  %v873_v55 = vld [vmem:[#allocation2 + $0x68] sm:$0xff] }
 0x15b   : > { %669 = vst [vmem:[#allocation2 + $0x70] sm:$0x30] %v667_v53  ;;  %v1109_v56 = vpack.c.bf16 %v873_v55, %v872_v54 }
 0x15c   : > { %v677_v57 = vpop.permute.xlu1 %676 }
 0x15d   : > { %v675_v58 = vpop.permute.xlu0 %674  ;;  %1110 = vmatpush3.bf16.msra.mxu0 %v1109_v56 }
 0x15e   : > { %v678_v59 = vsel %vm342_vm13, %v675_v58, %v677_v57  ;;  %1111 = vmatprep.subr.bf16.mxu0 %v1183_v14 }
 0x15f   : > { %680 = vst [vmem:[#allocation2 + $0x74] sm:$0x30] %v678_v59 }
 0x160   : > { %v688_v60 = vpop.permute.xlu1 %687 }
 0x161   : > { %v686_v61 = vpop.permute.xlu0 %685 }
 0x162   : > { %v689_v62 = vsel %vm354_vm14, %v686_v61, %v688_v60 }
 0x163   : > { %691 = vst [vmem:[#allocation2 + $0x78] sm:$0x30] %v689_v62 }
 0x164   : > { %v822_v63 = vpop.permute.xlu1 %821 }
 0x165   : > { %v820_v0 = vpop.permute.xlu0 %819 }
 0x166   : > { %v823_v1 = vsel %vm318_vm11, %v820_v0, %v822_v63 }
 0x167   : > { %825 = vst [vmem:[#allocation2 + $0x6c] sm:$0xc0] %v823_v1 }
 0x168   : > { %v833_v2 = vpop.permute.xlu1 %832 }
 0x169   : > { %v831_v3 = vpop.permute.xlu0 %830 }
 0x16a   : > { %v834_v4 = vsel %vm330_vm12, %v831_v3, %v833_v2 }
 0x16b   : > { %836 = vst [vmem:[#allocation2 + $0x70] sm:$0xc0] %v834_v4 }
 0x16c   : > { %v844_v5 = vpop.permute.xlu1 %843 }
 0x16d   : > { %v842_v6 = vpop.permute.xlu0 %841 }
 0x16e   : > { %v845_v14 = vsel %vm342_vm13, %v842_v6, %v844_v5 }
 0x16f   : > { %847 = vst [vmem:[#allocation2 + $0x74] sm:$0xc0] %v845_v14 }
 0x170   : > { %v855_v7 = vpop.permute.xlu1 %854 }
 0x171   : > { %v853_v8 = vpop.permute.xlu0 %852 }
 0x172   : > { %v856_v9 = vsel %vm354_vm14, %v853_v8, %v855_v7  ;;  %v874_v10 = vld [vmem:[#allocation2 + $0x70] sm:$0xff] }
 0x173   : > { %858 = vst [vmem:[#allocation2 + $0x78] sm:$0xc0] %v856_v9 }
 0x17a   : > { %v875_v11 = vld [vmem:[#allocation2 + $0x78] sm:$0xff] }
 0x17b   : > { %v1112_v12 = vpack.c.bf16 %v875_v11, %v874_v10 }
 0x17d   : > { %1113 = vmatpush3.bf16.msra.mxu0 %v1112_v12 }
 0x180   : > { %1088 = vmatmul.mubr.f32.vlgmr.msra.gmra.mrb[0].mxu0 %v859_v13 }
 0x253   : > { %v942_v15 = vpop.f32.mrb[0].mxu0 }
 0x254   : > { %946 = vst [vmem:[%s175_s13] sm:$0xff] %v942_v15  ;;  %v1089_v16 = vpop.f32.mrb[1].mxu0 }
 0x255 PF: > { %s12_s11 = sadd.s32 1, %s1178_s11   ;;  %s1570_s9 = smov %s1174_s10 }
 0x256   : > { %p9_p5 = scmp.ge.s32.totalorder %s12_s11, 4   ;;  %s1571_s10 = smov %s1573_s12 }
 0x258   :  { %11 = sbr.rel (!%p9_p5) target bundleno = 2 (0x2), region = 58 }

</bundles_post_ra>
